<compile_context>
chip_gen: v5e
topology: v5e:2x2
jax: 0.10.0
libtpu: 0.0.40
codegen_flags: <defaults>
</compile_context>

<pallas_src>
import math

import jax
import jax.numpy as jnp
from jax.experimental import pallas as pl
from jax.experimental.pallas import tpu as pltpu


def _round_up(x, m):
    return ((x + m - 1) // m) * m


def _lcm(a, b):
    return a * b // math.gcd(a, b)


def _tpu_kind():
    try:
        return jax.devices()[0].device_kind.lower()
    except Exception:
        return ""


def _pick_fold(node_dim, emb, big_fold):
    """Fold factor F: folded minor dims become 128-lane dense."""
    # Output lane-density: F*emb a multiple of 128 (or emb already >= 128).
    if emb >= 128 or 128 % emb != 0:
        f_out = 1
    else:
        f_out = 128 // emb
    if not big_fold:
        return max(f_out, 1)
    # v6e / v7x: also make the INPUT minor dim (F*node_dim) a multiple of 128.
    f_in = 128 // math.gcd(node_dim, 128)
    F = _lcm(max(f_out, 1), f_in)
    # Keep the VMEM-resident kron(I_F, W) small and lanes manageable.
    if (F * node_dim) * (F * emb) * 4 > (4 << 20) or F * emb > 4096:
        return max(f_out, 1)
    return F


# ----------------------------------------------------------------------------
# Pallas kernel (one row tile): folded linear + on-the-fly sinusoidal pos-enc
# ----------------------------------------------------------------------------
def _embed_kernel(xf_ref, pf_ref, w_ref, s_ref, b_ref, o_ref):
    # xf_ref : [TRf, F*node_dim]     folded input rows             (streamed)
    # pf_ref : [TRf, F+1]            per-row positions + const 1   (streamed)
    # w_ref  : [F*node_dim, F*emb]   kron(I_F, W)                  (VMEM resident)
    # s_ref  : [F+1, F*emb]          [kron(I_F, inv_freq); phase]  (VMEM resident)
    # b_ref  : [1, F*emb]            bias tiled F times            (VMEM resident)
    # o_ref  : [TRf, F*emb]          folded output rows
    acc = jnp.dot(xf_ref[...], w_ref[...], preferred_element_type=jnp.float32)
    # angle = pos * inv_freq + phase  (phase = pi/2 on odd features -> cos).
    angle = jnp.dot(pf_ref[...], s_ref[...], preferred_element_type=jnp.float32)
    o_ref[...] = (acc + b_ref[...] + jnp.sin(angle)).astype(o_ref.dtype)


def embedding_forward(x, solutions, weight_t, bias, *,
                      max_row_tile=16384, out_dtype=jnp.float32):
    """x: [B,N,node_dim] f32, solutions: [B,N] int, weight_t: [node_dim,emb], bias: [1,emb]."""
    B, N, node_dim = x.shape
    emb = weight_t.shape[1]
    R = B * N

    kind = _tpu_kind()
    is_v5e = ("v5 lite" in kind) or ("v5e" in kind) or ("v5litepod" in kind)
    is_v7 = "v7" in kind
    big_fold = not is_v5e          # v5e: keep fold small (MXU/HBM much slower)
    two_core = is_v7               # v7x: 2 TCs -> want >= 2 grid steps

    F = _pick_fold(node_dim, emb, big_fold)
    lanes = F * emb
    out_bytes = jnp.dtype(out_dtype).itemsize

    # --- Row tile: big (per-grid-step overhead ~0.35 us dominates small tiles),
    # sized against a VMEM budget for the double-buffered streamed blocks.
    bytes_per_row = 2.0 * (4 * node_dim + 4 * (F + 1) / F + out_bytes * emb)
    tr = min(max_row_tile, max(int((12 << 20) / bytes_per_row), 8 * F))
    tr = _round_up(tr, 8 * F)

    rp0 = _round_up(R, 8 * F)
    tr = min(tr, rp0)
    if two_core and rp0 >= 2 * 8 * F:
        # Keep at least 2 grid steps so "parallel" shards across both TensorCores.
        tr = min(tr, _round_up((rp0 + 1) // 2, 8 * F))
    rp = _round_up(R, tr)
    trf = tr // F

    # Position of each node inside the `solutions` permutation.
    pos = jnp.argsort(solutions, axis=-1).astype(jnp.float32).reshape(R)
    x2d = x.reshape(R, node_dim).astype(jnp.float32)
    if rp != R:
        x2d = jnp.pad(x2d, ((0, rp - R), (0, 0)))
        pos = jnp.pad(pos, (0, rp - R))

    xf = x2d.reshape(rp // F, F * node_dim)                       # free row-major fold
    posf = jnp.concatenate(
        [pos.reshape(rp // F, F),
         jnp.ones((rp // F, 1), jnp.float32)], axis=1)            # const-1 col (phase)

    eye_f = jnp.eye(F, dtype=jnp.float32)
    w_bd = jnp.kron(eye_f, weight_t.astype(jnp.float32))          # [F*nd, lanes]
    j = jnp.arange(emb, dtype=jnp.float32)
    inv_freq = jnp.power(10000.0, -2.0 * jnp.floor(j / 2.0) / emb)[None, :]
    phase = jnp.where(jnp.arange(emb) % 2 == 0, 0.0, jnp.pi / 2.0).astype(jnp.float32)
    s_bd = jnp.concatenate(
        [jnp.kron(eye_f, inv_freq),                               # [F, lanes]
         jnp.tile(phase[None, :], (1, F))], axis=0)               # + phase row -> [F+1, lanes]
    b_f = jnp.tile(bias.reshape(1, emb).astype(jnp.float32), (1, F))   # [1, lanes]

    grid = (rp // tr,)
    cost = pl.CostEstimate(
        flops=int(2 * rp * node_dim * F * emb          # block-diag linear
                  + 2 * rp * (F + 1) * emb             # angle matmul
                  + 2 * rp * emb),                     # bias + pe adds
        transcendentals=int(rp * emb),                 # one sin per element
        bytes_accessed=int(4 * (rp * node_dim + rp * (F + 1) // F)
                           + out_bytes * rp * emb
                           + 4 * (F * node_dim * lanes + (F + 1) * lanes + lanes)),
    )

    # Explicit VMEM limit only if the estimate exceeds the default scoped limit
    # (matters on v7x: 64 MiB physical, 32 MiB default scope).
    resident = 4 * (F * node_dim * lanes + (F + 1) * lanes + lanes)
    streamed = 2 * (4 * trf * (F * node_dim) + 4 * trf * (F + 1)
                    + out_bytes * trf * lanes)
    vmem_need = 2 * resident + streamed                # conservative
    cparams = {"dimension_semantics": ("parallel",)}
    if vmem_need > (24 << 20):
        cap = (56 << 20) if is_v7 else (100 << 20)
        cparams["vmem_limit_bytes"] = int(min(cap, vmem_need * 5 // 4 + (2 << 20)))

    outf = pl.pallas_call(
        _embed_kernel,
        out_shape=jax.ShapeDtypeStruct((rp // F, lanes), out_dtype),
        grid_spec=pltpu.PrefetchScalarGridSpec(
            num_scalar_prefetch=0,
            grid=grid,
            in_specs=[
                pl.BlockSpec((trf, F * node_dim), lambda i: (i, 0)),
                pl.BlockSpec((trf, F + 1), lambda i: (i, 0)),
                pl.BlockSpec((F * node_dim, lanes), lambda i: (0, 0)),
                pl.BlockSpec((F + 1, lanes), lambda i: (0, 0)),
                pl.BlockSpec((1, lanes), lambda i: (0, 0)),
            ],
            out_specs=pl.BlockSpec((trf, lanes), lambda i: (i, 0)),
        ),
        compiler_params=pltpu.CompilerParams(**cparams),
        cost_estimate=cost,
    )(xf, posf, w_bd, s_bd, b_f)

    out2d = outf.reshape(rp, emb)[:R]          # free unfold + trim pad rows
    return out2d.reshape(B, N, emb)


# ----------------------------------------------------------------------------
# Pure-JAX reference for the positional encoding (same assumed semantics)
# ----------------------------------------------------------------------------
def _sinusoid_table(n_position, emb_dim):
    pos = jnp.arange(n_position, dtype=jnp.float32)[:, None]            # [P,1]
    j = jnp.arange(emb_dim, dtype=jnp.float32)[None, :]                 # [1,E]
    angle = pos * jnp.power(10000.0, -2.0 * jnp.floor(j / 2.0) / emb_dim)
    even_mask = (jnp.arange(emb_dim) % 2 == 0)
    return jnp.where(even_mask[None, :], jnp.sin(angle), jnp.cos(angle))


def position_encoding_ref(solutions, embedding_dim):
    B, N = solutions.shape
    table = _sinusoid_table(N, embedding_dim)                            # [N,E]
    pos_of_node = jnp.argsort(solutions, axis=-1)                        # [B,N]
    return table[pos_of_node]                                            # [B,N,E]


# ----------------------------------------------------------------------------
# EmbeddingNet wrapper
# ----------------------------------------------------------------------------
class EmbeddingNet:
    def __init__(self, node_dim, embedding_dim, key):
        self.node_dim = node_dim
        self.embedding_dim = embedding_dim
        kw, kb = jax.random.split(key)
        bound = 1.0 / math.sqrt(node_dim)
        # torch stores weight as [out, in]; keep the transposed [in, out] for the kernel.
        self.weight_t = jax.random.uniform(
            kw, (node_dim, embedding_dim), jnp.float32, -bound, bound)
        self.bias = jax.random.uniform(
            kb, (1, embedding_dim), jnp.float32, -bound, bound)

    def __call__(self, x, solutions):
        # x: [B, N, node_dim] float32 ; solutions: [B, N] int32
        return embedding_forward(x, solutions, self.weight_t, self.bias)


# ----------------------------------------------------------------------------
if __name__ == "__main__":
    key = jax.random.PRNGKey(0)
    k_param, k_x, k_perm = jax.random.split(key, 3)

    batch, seq, node_dim, embedding_dim = 2, 8, 4, 32

    net = EmbeddingNet(node_dim, embedding_dim, k_param)

    x = jax.random.normal(k_x, (batch, seq, node_dim), dtype=jnp.float32)
    # solutions: a permutation of node indices per batch element
    solutions = jnp.stack(
        [jax.random.permutation(jax.random.fold_in(k_perm, b), seq)
         for b in range(batch)], axis=0).astype(jnp.int32)

    out = net(x, solutions)
    out = jax.block_until_ready(out)

    # Pure-JAX reference check (full-precision matmul to compare against MXU f32)
    lin = jnp.dot(x.reshape(batch * seq, node_dim), net.weight_t,
                  precision=jax.lax.Precision.HIGHEST) + net.bias
    ref = lin.reshape(batch, seq, embedding_dim) + position_encoding_ref(
        solutions, embedding_dim)

    assert out.shape == (batch, seq, embedding_dim)
    err = float(jnp.max(jnp.abs(out - ref)))
    assert jnp.allclose(out, ref, atol=2e-4, rtol=2e-4), f"max abs err {err}"

    print("KERNEL_OK")
</pallas_src>

<mosaic_0001>
module attributes {stable_mosaic.version = 11 : i64} {
  func.func @_embed_kernel(%arg0: i32, %arg1: memref<8x128xf32, #tpu.memory_space<vmem>>, %arg2: memref<8x33xf32, #tpu.memory_space<vmem>>, %arg3: memref<128x1024xf32, #tpu.memory_space<vmem>>, %arg4: memref<33x1024xf32, #tpu.memory_space<vmem>>, %arg5: memref<1x1024xf32, #tpu.memory_space<vmem>>, %arg6: memref<8x1024xf32, #tpu.memory_space<vmem>>) attributes {dimension_semantics = [#tpu.dimension_semantics<parallel>], iteration_bounds = array<i64: 1>, scalar_prefetch = 0 : i64, scratch_operands = 0 : i64, tpu.core_type = #tpu.core_type<tc>, window_params = [{transform_indices = @transform_0, window_bounds = array<i64: 8, 128>}, {transform_indices = @transform_1, window_bounds = array<i64: 8, 33>}, {pipeline_mode = #tpu.pipeline_mode<synchronous>, transform_indices = @transform_2, window_bounds = array<i64: 128, 1024>}, {pipeline_mode = #tpu.pipeline_mode<synchronous>, transform_indices = @transform_3, window_bounds = array<i64: 33, 1024>}, {pipeline_mode = #tpu.pipeline_mode<synchronous>, transform_indices = @transform_4, window_bounds = array<i64: 1, 1024>}, {transform_indices = @transform_5, window_bounds = array<i64: 8, 1024>}]} {
    %c0 = arith.constant 0 : index
    %c0_0 = arith.constant 0 : index
    %0 = vector.load %arg1[%c0, %c0_0] : memref<8x128xf32, #tpu.memory_space<vmem>>, vector<8x128xf32>
    %c0_1 = arith.constant 0 : index
    %c0_2 = arith.constant 0 : index
    %1 = vector.load %arg3[%c0_1, %c0_2] : memref<128x1024xf32, #tpu.memory_space<vmem>>, vector<128x1024xf32>
    %cst = arith.constant dense<0.000000e+00> : vector<8x1024xf32>
    %2 = tpu.matmul %0, %1, %cst {dimension_numbers = #tpu.dot_dimension_numbers<[1], [0], [0], [1], [0, 0, 1, 1], [], []>} : vector<8x128xf32>, vector<128x1024xf32>, vector<8x1024xf32> -> vector<8x1024xf32>
    %c0_3 = arith.constant 0 : index
    %c0_4 = arith.constant 0 : index
    %3 = vector.load %arg2[%c0_3, %c0_4] : memref<8x33xf32, #tpu.memory_space<vmem>>, vector<8x33xf32>
    %c0_5 = arith.constant 0 : index
    %c0_6 = arith.constant 0 : index
    %4 = vector.load %arg4[%c0_5, %c0_6] : memref<33x1024xf32, #tpu.memory_space<vmem>>, vector<33x1024xf32>
    %cst_7 = arith.constant dense<0.000000e+00> : vector<8x1024xf32>
    %5 = tpu.matmul %3, %4, %cst_7 {dimension_numbers = #tpu.dot_dimension_numbers<[1], [0], [0], [1], [0, 0, 1, 1], [], []>} : vector<8x33xf32>, vector<33x1024xf32>, vector<8x1024xf32> -> vector<8x1024xf32>
    %c0_8 = arith.constant 0 : index
    %c0_9 = arith.constant 0 : index
    %6 = vector.load %arg5[%c0_8, %c0_9] : memref<1x1024xf32, #tpu.memory_space<vmem>>, vector<1x1024xf32>
    %7 = vector.broadcast %6 : vector<1x1024xf32> to vector<8x1024xf32>
    %8 = arith.addf %2, %7 : vector<8x1024xf32>
    %9 = math.sin %5 : vector<8x1024xf32>
    %10 = arith.addf %8, %9 : vector<8x1024xf32>
    %c0_10 = arith.constant 0 : index
    %c0_11 = arith.constant 0 : index
    %11 = vector.load %arg6[%c0_10, %c0_11] : memref<8x1024xf32, #tpu.memory_space<vmem>>, vector<8x1024xf32>
    tpu.vector_store %arg6[%c0_10, %c0_11], %10 {strides = array<i32>} : memref<8x1024xf32, #tpu.memory_space<vmem>>, vector<8x1024xf32>,
    return
  }
  func.func @transform_0(%arg0: i32) -> (i32, i32) {
    %c0_i32 = arith.constant 0 : i32
    %c0_i32_0 = arith.constant 0 : i32
    return %arg0, %c0_i32 : i32, i32
  }
  func.func @transform_1(%arg0: i32) -> (i32, i32) {
    %c0_i32 = arith.constant 0 : i32
    %c0_i32_0 = arith.constant 0 : i32
    return %arg0, %c0_i32 : i32, i32
  }
  func.func @transform_2(%arg0: i32) -> (i32, i32) {
    %c0_i32 = arith.constant 0 : i32
    %c0_i32_0 = arith.constant 0 : i32
    %c0_i32_1 = arith.constant 0 : i32
    return %c0_i32, %c0_i32_0 : i32, i32
  }
  func.func @transform_3(%arg0: i32) -> (i32, i32) {
    %c0_i32 = arith.constant 0 : i32
    %c0_i32_0 = arith.constant 0 : i32
    %c0_i32_1 = arith.constant 0 : i32
    return %c0_i32, %c0_i32_0 : i32, i32
  }
  func.func @transform_4(%arg0: i32) -> (i32, i32) {
    %c0_i32 = arith.constant 0 : i32
    %c0_i32_0 = arith.constant 0 : i32
    %c0_i32_1 = arith.constant 0 : i32
    return %c0_i32, %c0_i32_0 : i32, i32
  }
  func.func @transform_5(%arg0: i32) -> (i32, i32) {
    %c0_i32 = arith.constant 0 : i32
    %c0_i32_0 = arith.constant 0 : i32
    return %arg0, %c0_i32 : i32, i32
  }
}

</mosaic_0001>

<bundles_post_ra>
// kernel: tpu_custom_call.1
= control target key start
LH: loop header
LB: loop body
LE: loop exit
PB: predicated region body
PF: predicated region fallthrough
CT: control target
= control target key end

     0   :  { %10 = vsyncpa [#allocation3], 0  ;;  %s3325_s0 = inlined_call_operand.hbm [shape: f32[8,128], index: 0, kind: input, shape index: {}]   ;;  %s3326_s1 = inlined_call_operand.hbm [shape: f32[8,33], index: 1, kind: input, shape index: {}]   ;;  %s3327_s2 = inlined_call_operand.hbm [shape: f32[128,1024], index: 2, kind: input, shape index: {}]   ;;  %s3328_s3 = inlined_call_operand.hbm [shape: f32[33,1024], index: 3, kind: input, shape index: {}]   ;;  %s3329_s4 = inlined_call_operand.hbm [shape: f32[1,1024], index: 4, kind: input, shape index: {}]   ;;  %s3330_s5 = inlined_call_operand.hbm [shape: f32[8,1024], index: 5, kind: output, shape index: {}]  }
   0x1   :  { %11 = vsyncpa [#allocation6], 0 }
   0x2   :  { %12 = vsyncpa [#allocation9], 0  ;;  %s30_s20 = sshll.u32 %s3326_s1, 4  ;;  %s31_s20 = int_to_ptr.hbm [resolvable:$true] %s30_s20 }
   0x3   :  { %13 = vsyncpa [#allocation4], 0  ;;  %s2112_s21 = smov [#allocation5]   ;;  %s53_s25 = sshll.u32 %s3328_s3, 4  ;;  %s54_s25 = int_to_ptr.hbm [resolvable:$true] %s53_s25 }
   0x4   :  { %s32_s22 = sshll.u32 %s2112_s21, 4  ;;  %s2113_s26 = smov [#allocation8]   ;;  %s33_s22 = int_to_ptr.vmem [resolvable:$true] %s32_s22 }
   0x5   :  { %35 = dma.hbm_to_vmem [thread:$0]  %s31_s20, 128, %s33_s22, [#allocation6]  }
   0x6   :  { %s55_s27 = sshll.u32 %s2113_s26, 4  ;;  %s19_s30 = sshll.u32 %s3325_s0, 4  ;;  %s56_s27 = int_to_ptr.vmem [resolvable:$true] %s55_s27  ;;  %s20_s30 = int_to_ptr.hbm [resolvable:$true] %s19_s30 }
   0x7   :  { %s2114_s1 = smov 1024   ;;  %s2115_s6 = smov 64  }
   0x8   :  { %61 = dma.hbm_to_vmem [thread:$0]  %s54_s25, 5120, %s56_s27, [#allocation9], %s2114_s1, %s2114_s1, %s2115_s6  }
   0x9   :  { %s40_s9 = sshll.u32 %s3327_s2, 4  ;;  %s2116_s10 = smov [#allocation2]   ;;  %s41_s9 = int_to_ptr.hbm [resolvable:$true] %s40_s9 }
   0xa   :  { %s21_s11 = sshll.u32 %s2116_s10, 4  ;;  %s2117_s3 = smov [#allocation7]   ;;  %s22_s11 = int_to_ptr.vmem [resolvable:$true] %s21_s11 }
   0xb   :  { %24 = dma.hbm_to_vmem [thread:$0]  %s20_s30, 128, %s22_s11, [#allocation3]  }
   0xc   :  { %s42_s12 = sshll.u32 %s2117_s3, 4  ;;  %s67_s0 = sshll.u32 %s3329_s4, 4  ;;  %s43_s12 = int_to_ptr.vmem [resolvable:$true] %s42_s12  ;;  %s68_s0 = int_to_ptr.hbm [resolvable:$true] %s67_s0 }
   0xd   :  { %48 = dma.hbm_to_vmem [thread:$0]  %s41_s9, 16384, %s43_s12, [#allocation6], %s2114_s1, %s2114_s1, %s2115_s6  }
   0xe   :  { %s2118_s15 = smov [#allocation10]  }
   0xf   :  { %s69_s16 = sshll.u32 %s2118_s15, 4  ;;  %s70_s16 = int_to_ptr.vmem [resolvable:$true] %s69_s16 }
  0x10   :  { %72 = dma.hbm_to_vmem [thread:$0]  %s68_s0, 128, %s70_s16, [#allocation9]  }
  0x11   :  { %2104 = dma.done.wait [#allocation3], 128  }
  0x12   :  { %2105 = vsyncadd [#allocation3], 4294967168 }
  0x13   :  { %2106 = dma.done.wait [#allocation6], 16512  }
  0x14   :  { %2107 = vsyncadd [#allocation6], 4294950784 }
  0x15   :  { %2108 = dma.done.wait [#allocation9], 5248  }
  0x16   :  { %2109 = vsyncadd [#allocation9], 4294962048  ;;  %vm267_vm0 = vcmask 1040384   ;;  %v255_v0 = vld [vmem:[#allocation8 + $0x100] sm:$0x1]  ;;  %v248_v5 = vld [vmem:[#allocation8 + $0xc8] sm:$0xff] }
  0x17   :  { %v256_v1 = vld [vmem:[#allocation8 + $0x108] sm:$0x1]  ;;  %v257_v2 = vld [vmem:[#allocation8 + $0x110] sm:$0x1]  ;;  %1905 = vmatpush.msk.msra.mxu0 %vm267_vm0, %v255_v0  ;;  %v258_v3 = vld [vmem:[#allocation8 + $0x118] sm:$0x1] }
  0x18   :  { %1907 = vmatpush.msk.msra.mxu1 %vm267_vm0, %v256_v1  ;;  %v247_v4 = vld [vmem:[#allocation8 + $0xc0] sm:$0xff]  ;;  %1909 = vmatpush.msk.msra.mxu2 %vm267_vm0, %v257_v2  ;;  %v249_v6 = vld [vmem:[#allocation8 + $0xd0] sm:$0xff]  ;;  %v250_v7 = vld [vmem:[#allocation8 + $0xd8] sm:$0xff]  ;;  %vm263_vm1 = vcmask 269312   ;;  %s2126_s2 = smov [#allocation11]   ;;  %s1893_s19 = sshll.u32 %s3330_s5, 4  ;;  %s1894_s19 = int_to_ptr.hbm [resolvable:$true] %s1893_s19 }
  0x19   :  { %1911 = vmatpush.msk.msra.mxu3 %vm267_vm0, %v258_v3  ;;  %v239_v8 = vld [vmem:[#allocation8 + $0x80] sm:$0xff]  ;;  %304 = vmatpush.msra.mxu0 %v247_v4  ;;  %v240_v9 = vld [vmem:[#allocation8 + $0x88] sm:$0xff]  ;;  %v241_v10 = vld [vmem:[#allocation8 + $0x90] sm:$0xff]  ;;  %s1891_s4 = sshll.u32 %s2126_s2, 4  ;;  %s1892_s4 = int_to_ptr.vmem [resolvable:$true] %s1891_s4 }
  0x1a   :  { %324 = vmatpush.msra.mxu1 %v248_v5  ;;  %v242_v11 = vld [vmem:[#allocation8 + $0x98] sm:$0xff]  ;;  %344 = vmatpush.msra.mxu2 %v249_v6  ;;  %v231_v12 = vld [vmem:[#allocation8 + $0x40] sm:$0xff]  ;;  %v232_v13 = vld [vmem:[#allocation8 + $0x48] sm:$0xff] }
  0x1b   :  { %364 = vmatpush.msra.mxu3 %v250_v7  ;;  %305 = vmatpush.msra.mxu0 %v239_v8  ;;  %v233_v14 = vld [vmem:[#allocation8 + $0x50] sm:$0xff]  ;;  %v234_v15 = vld [vmem:[#allocation8 + $0x58] sm:$0xff]  ;;  %v223_v16 = vld [vmem:[#allocation8] sm:$0xff] }
  0x1c   :  { %325 = vmatpush.msra.mxu1 %v240_v9  ;;  %345 = vmatpush.msra.mxu2 %v241_v10  ;;  %v224_v17 = vld [vmem:[#allocation8 + $0x8] sm:$0xff]  ;;  %v225_v18 = vld [vmem:[#allocation8 + $0x10] sm:$0xff]  ;;  %v226_v19 = vld [vmem:[#allocation8 + $0x18] sm:$0xff] }
  0x1d   :  { %365 = vmatpush.msra.mxu3 %v242_v11  ;;  %306 = vmatpush.msra.mxu0 %v231_v12  ;;  %v222_v20 = vld [vmem:[#allocation5] sm:$0xff]  ;;  %v259_v21 = vld [vmem:[#allocation8 + $0x120] sm:$0x1]  ;;  %v260_v22 = vld [vmem:[#allocation8 + $0x128] sm:$0x1] }
  0x1e   :  { %326 = vmatpush.msra.mxu1 %v232_v13  ;;  %346 = vmatpush.msra.mxu2 %v233_v14  ;;  %v261_v23 = vld [vmem:[#allocation8 + $0x130] sm:$0x1]  ;;  %v262_v24 = vld [vmem:[#allocation8 + $0x138] sm:$0x1]  ;;  %v251_v25 = vld [vmem:[#allocation8 + $0xe0] sm:$0xff] }
  0x1f   :  { %366 = vmatpush.msra.mxu3 %v234_v15  ;;  %307 = vmatpush.msra.mxu0 %v223_v16  ;;  %v252_v26 = vld [vmem:[#allocation8 + $0xe8] sm:$0xff]  ;;  %v253_v27 = vld [vmem:[#allocation8 + $0xf0] sm:$0xff]  ;;  %v254_v28 = vld [vmem:[#allocation8 + $0xf8] sm:$0xff] }
  0x20   :  { %327 = vmatpush.msra.mxu1 %v224_v17  ;;  %347 = vmatpush.msra.mxu2 %v225_v18  ;;  %v243_v29 = vld [vmem:[#allocation8 + $0xa0] sm:$0xff]  ;;  %v244_v30 = vld [vmem:[#allocation8 + $0xa8] sm:$0xff]  ;;  %v245_v31 = vld [vmem:[#allocation8 + $0xb0] sm:$0xff] }
  0x21   :  { %367 = vmatpush.msra.mxu3 %v226_v19  ;;  %1906 = vmatmul.msk.f32.vlgmr.msra.gmra.mxu0 %vm263_vm1, %v222_v20  ;;  %v246_v32 = vld [vmem:[#allocation8 + $0xb8] sm:$0xff]  ;;  %v235_v33 = vld [vmem:[#allocation8 + $0x60] sm:$0xff]  ;;  %v236_v34 = vld [vmem:[#allocation8 + $0x68] sm:$0xff] }
  0x22   :  { %1908 = vmatmul.msk.f32.vlgmr.msra.gmra.mxu1 %vm263_vm1, %v222_v20  ;;  %1910 = vmatmul.msk.f32.vlgmr.msra.gmra.mxu2 %vm263_vm1, %v222_v20  ;;  %v237_v35 = vld [vmem:[#allocation8 + $0x70] sm:$0xff]  ;;  %v238_v36 = vld [vmem:[#allocation8 + $0x78] sm:$0xff]  ;;  %v227_v37 = vld [vmem:[#allocation8 + $0x20] sm:$0xff] }
  0x23   :  { %1912 = vmatmul.msk.f32.vlgmr.msra.gmra.mxu3 %vm263_vm1, %v222_v20  ;;  %1913 = vmatpush.msk.msrb.mxu0 %vm267_vm0, %v259_v21  ;;  %v228_v38 = vld [vmem:[#allocation8 + $0x28] sm:$0xff]  ;;  %v229_v39 = vld [vmem:[#allocation8 + $0x30] sm:$0xff]  ;;  %v230_v40 = vld [vmem:[#allocation8 + $0x38] sm:$0xff] }
  0x24   :  { %1915 = vmatpush.msk.msrb.mxu1 %vm267_vm0, %v260_v22  ;;  %1917 = vmatpush.msk.msrb.mxu2 %vm267_vm0, %v261_v23  ;;  %v214_v41 = vld [vmem:[#allocation7 + $0x3c0] sm:$0xff]  ;;  %v215_v42 = vld [vmem:[#allocation7 + $0x3c8] sm:$0xff]  ;;  %v216_v43 = vld [vmem:[#allocation7 + $0x3d0] sm:$0xff] }
  0x25   :  { %1919 = vmatpush.msk.msrb.mxu3 %vm267_vm0, %v262_v24  ;;  %384 = vmatpush.msrb.mxu0 %v251_v25  ;;  %v217_v44 = vld [vmem:[#allocation7 + $0x3d8] sm:$0xff]  ;;  %v206_v45 = vld [vmem:[#allocation7 + $0x380] sm:$0xff]  ;;  %v207_v46 = vld [vmem:[#allocation7 + $0x388] sm:$0xff] }
  0x26   :  { %404 = vmatpush.msrb.mxu1 %v252_v26  ;;  %424 = vmatpush.msrb.mxu2 %v253_v27  ;;  %v208_v47 = vld [vmem:[#allocation7 + $0x390] sm:$0xff]  ;;  %v209_v48 = vld [vmem:[#allocation7 + $0x398] sm:$0xff]  ;;  %v198_v49 = vld [vmem:[#allocation7 + $0x340] sm:$0xff] }
  0x27   :  { %444 = vmatpush.msrb.mxu3 %v254_v28  ;;  %385 = vmatpush.msrb.mxu0 %v243_v29  ;;  %v199_v50 = vld [vmem:[#allocation7 + $0x348] sm:$0xff]  ;;  %v200_v51 = vld [vmem:[#allocation7 + $0x350] sm:$0xff]  ;;  %v201_v52 = vld [vmem:[#allocation7 + $0x358] sm:$0xff] }
  0x28   :  { %405 = vmatpush.msrb.mxu1 %v244_v30  ;;  %425 = vmatpush.msrb.mxu2 %v245_v31  ;;  %v190_v53 = vld [vmem:[#allocation7 + $0x300] sm:$0xff]  ;;  %v191_v54 = vld [vmem:[#allocation7 + $0x308] sm:$0xff]  ;;  %v192_v55 = vld [vmem:[#allocation7 + $0x310] sm:$0xff] }
  0x29   :  { %445 = vmatpush.msrb.mxu3 %v246_v32  ;;  %386 = vmatpush.msrb.mxu0 %v235_v33  ;;  %v193_v56 = vld [vmem:[#allocation7 + $0x318] sm:$0xff]  ;;  %v182_v57 = vld [vmem:[#allocation7 + $0x2c0] sm:$0xff]  ;;  %v183_v58 = vld [vmem:[#allocation7 + $0x2c8] sm:$0xff] }
  0x2a   :  { %406 = vmatpush.msrb.mxu1 %v236_v34  ;;  %426 = vmatpush.msrb.mxu2 %v237_v35  ;;  %v184_v59 = vld [vmem:[#allocation7 + $0x2d0] sm:$0xff]  ;;  %v185_v60 = vld [vmem:[#allocation7 + $0x2d8] sm:$0xff]  ;;  %v174_v61 = vld [vmem:[#allocation7 + $0x280] sm:$0xff] }
  0x2b   :  { %446 = vmatpush.msrb.mxu3 %v238_v36  ;;  %387 = vmatpush.msrb.mxu0 %v227_v37  ;;  %v175_v62 = vld [vmem:[#allocation7 + $0x288] sm:$0xff]  ;;  %v176_v63 = vld [vmem:[#allocation7 + $0x290] sm:$0xff]  ;;  %v177_v0 = vld [vmem:[#allocation7 + $0x298] sm:$0xff] }
  0x2c   :  { %407 = vmatpush.msrb.mxu1 %v228_v38  ;;  %427 = vmatpush.msrb.mxu2 %v229_v39  ;;  %v166_v1 = vld [vmem:[#allocation7 + $0x240] sm:$0xff]  ;;  %v167_v2 = vld [vmem:[#allocation7 + $0x248] sm:$0xff]  ;;  %v168_v3 = vld [vmem:[#allocation7 + $0x250] sm:$0xff] }
  0x2d   :  { %447 = vmatpush.msrb.mxu3 %v230_v40  ;;  %1914 = vmatmul.msk.f32.vlgmr.msrb.gmra.mxu0 %vm263_vm1, %v222_v20  ;;  %v169_v4 = vld [vmem:[#allocation7 + $0x258] sm:$0xff]  ;;  %v158_v5 = vld [vmem:[#allocation7 + $0x200] sm:$0xff]  ;;  %v159_v6 = vld [vmem:[#allocation7 + $0x208] sm:$0xff] }
  0x2e   :  { %1916 = vmatmul.msk.f32.vlgmr.msrb.gmra.mxu1 %vm263_vm1, %v222_v20  ;;  %1918 = vmatmul.msk.f32.vlgmr.msrb.gmra.mxu2 %vm263_vm1, %v222_v20  ;;  %v160_v7 = vld [vmem:[#allocation7 + $0x210] sm:$0xff]  ;;  %v161_v8 = vld [vmem:[#allocation7 + $0x218] sm:$0xff]  ;;  %v150_v9 = vld [vmem:[#allocation7 + $0x1c0] sm:$0xff] }
  0x2f   :  { %1920 = vmatmul.msk.f32.vlgmr.msrb.gmra.mxu3 %vm263_vm1, %v222_v20  ;;  %470 = vmatpush.msra.mxu0 %v214_v41  ;;  %v151_v10 = vld [vmem:[#allocation7 + $0x1c8] sm:$0xff]  ;;  %v152_v11 = vld [vmem:[#allocation7 + $0x1d0] sm:$0xff]  ;;  %v153_v12 = vld [vmem:[#allocation7 + $0x1d8] sm:$0xff] }
  0x30   :  { %490 = vmatpush.msra.mxu1 %v215_v42  ;;  %510 = vmatpush.msra.mxu2 %v216_v43  ;;  %v142_v13 = vld [vmem:[#allocation7 + $0x180] sm:$0xff]  ;;  %v143_v14 = vld [vmem:[#allocation7 + $0x188] sm:$0xff]  ;;  %v144_v15 = vld [vmem:[#allocation7 + $0x190] sm:$0xff] }
  0x31   :  { %530 = vmatpush.msra.mxu3 %v217_v44  ;;  %471 = vmatpush.msra.mxu0 %v206_v45  ;;  %v145_v16 = vld [vmem:[#allocation7 + $0x198] sm:$0xff]  ;;  %v134_v17 = vld [vmem:[#allocation7 + $0x140] sm:$0xff]  ;;  %v135_v18 = vld [vmem:[#allocation7 + $0x148] sm:$0xff] }
  0x32   :  { %491 = vmatpush.msra.mxu1 %v207_v46  ;;  %511 = vmatpush.msra.mxu2 %v208_v47  ;;  %v136_v19 = vld [vmem:[#allocation7 + $0x150] sm:$0xff]  ;;  %v137_v20 = vld [vmem:[#allocation7 + $0x158] sm:$0xff]  ;;  %v126_v21 = vld [vmem:[#allocation7 + $0x100] sm:$0xff] }
  0x33   :  { %531 = vmatpush.msra.mxu3 %v209_v48  ;;  %472 = vmatpush.msra.mxu0 %v198_v49  ;;  %v127_v22 = vld [vmem:[#allocation7 + $0x108] sm:$0xff]  ;;  %v128_v23 = vld [vmem:[#allocation7 + $0x110] sm:$0xff]  ;;  %v129_v24 = vld [vmem:[#allocation7 + $0x118] sm:$0xff] }
  0x34   :  { %492 = vmatpush.msra.mxu1 %v199_v50  ;;  %512 = vmatpush.msra.mxu2 %v200_v51  ;;  %v118_v25 = vld [vmem:[#allocation7 + $0xc0] sm:$0xff]  ;;  %v119_v26 = vld [vmem:[#allocation7 + $0xc8] sm:$0xff]  ;;  %v120_v27 = vld [vmem:[#allocation7 + $0xd0] sm:$0xff] }
  0x35   :  { %532 = vmatpush.msra.mxu3 %v201_v52  ;;  %473 = vmatpush.msra.mxu0 %v190_v53  ;;  %v121_v28 = vld [vmem:[#allocation7 + $0xd8] sm:$0xff]  ;;  %v110_v29 = vld [vmem:[#allocation7 + $0x80] sm:$0xff]  ;;  %v111_v30 = vld [vmem:[#allocation7 + $0x88] sm:$0xff] }
  0x36   :  { %493 = vmatpush.msra.mxu1 %v191_v54  ;;  %513 = vmatpush.msra.mxu2 %v192_v55  ;;  %v112_v31 = vld [vmem:[#allocation7 + $0x90] sm:$0xff]  ;;  %v113_v32 = vld [vmem:[#allocation7 + $0x98] sm:$0xff]  ;;  %v102_v33 = vld [vmem:[#allocation7 + $0x40] sm:$0xff] }
  0x37   :  { %533 = vmatpush.msra.mxu3 %v193_v56  ;;  %474 = vmatpush.msra.mxu0 %v182_v57  ;;  %v103_v34 = vld [vmem:[#allocation7 + $0x48] sm:$0xff]  ;;  %v104_v35 = vld [vmem:[#allocation7 + $0x50] sm:$0xff]  ;;  %v105_v36 = vld [vmem:[#allocation7 + $0x58] sm:$0xff] }
  0x38   :  { %494 = vmatpush.msra.mxu1 %v183_v58  ;;  %514 = vmatpush.msra.mxu2 %v184_v59  ;;  %v94_v37 = vld [vmem:[#allocation7] sm:$0xff]  ;;  %v95_v38 = vld [vmem:[#allocation7 + $0x8] sm:$0xff]  ;;  %v96_v39 = vld [vmem:[#allocation7 + $0x10] sm:$0xff] }
  0x39   :  { %534 = vmatpush.msra.mxu3 %v185_v60  ;;  %475 = vmatpush.msra.mxu0 %v174_v61  ;;  %v97_v40 = vld [vmem:[#allocation7 + $0x18] sm:$0xff]  ;;  %v218_v41 = vld [vmem:[#allocation7 + $0x3e0] sm:$0xff]  ;;  %v219_v42 = vld [vmem:[#allocation7 + $0x3e8] sm:$0xff] }
  0x3a   :  { %495 = vmatpush.msra.mxu1 %v175_v62  ;;  %515 = vmatpush.msra.mxu2 %v176_v63  ;;  %v220_v43 = vld [vmem:[#allocation7 + $0x3f0] sm:$0xff]  ;;  %v221_v44 = vld [vmem:[#allocation7 + $0x3f8] sm:$0xff]  ;;  %v210_v45 = vld [vmem:[#allocation7 + $0x3a0] sm:$0xff] }
  0x3b   :  { %535 = vmatpush.msra.mxu3 %v177_v0  ;;  %476 = vmatpush.msra.mxu0 %v166_v1  ;;  %v211_v46 = vld [vmem:[#allocation7 + $0x3a8] sm:$0xff]  ;;  %v212_v47 = vld [vmem:[#allocation7 + $0x3b0] sm:$0xff]  ;;  %v213_v48 = vld [vmem:[#allocation7 + $0x3b8] sm:$0xff] }
  0x3c   :  { %496 = vmatpush.msra.mxu1 %v167_v2  ;;  %516 = vmatpush.msra.mxu2 %v168_v3  ;;  %v202_v49 = vld [vmem:[#allocation7 + $0x360] sm:$0xff]  ;;  %v203_v50 = vld [vmem:[#allocation7 + $0x368] sm:$0xff]  ;;  %v204_v51 = vld [vmem:[#allocation7 + $0x370] sm:$0xff] }
  0x3d   :  { %536 = vmatpush.msra.mxu3 %v169_v4  ;;  %477 = vmatpush.msra.mxu0 %v158_v5  ;;  %v205_v52 = vld [vmem:[#allocation7 + $0x378] sm:$0xff]  ;;  %v194_v53 = vld [vmem:[#allocation7 + $0x320] sm:$0xff]  ;;  %v195_v54 = vld [vmem:[#allocation7 + $0x328] sm:$0xff] }
  0x3e   :  { %497 = vmatpush.msra.mxu1 %v159_v6  ;;  %517 = vmatpush.msra.mxu2 %v160_v7  ;;  %v196_v55 = vld [vmem:[#allocation7 + $0x330] sm:$0xff]  ;;  %v197_v56 = vld [vmem:[#allocation7 + $0x338] sm:$0xff]  ;;  %v186_v57 = vld [vmem:[#allocation7 + $0x2e0] sm:$0xff] }
  0x3f   :  { %537 = vmatpush.msra.mxu3 %v161_v8  ;;  %478 = vmatpush.msra.mxu0 %v150_v9  ;;  %v187_v58 = vld [vmem:[#allocation7 + $0x2e8] sm:$0xff]  ;;  %v188_v59 = vld [vmem:[#allocation7 + $0x2f0] sm:$0xff]  ;;  %v189_v60 = vld [vmem:[#allocation7 + $0x2f8] sm:$0xff] }
  0x40   :  { %498 = vmatpush.msra.mxu1 %v151_v10  ;;  %518 = vmatpush.msra.mxu2 %v152_v11  ;;  %v178_v61 = vld [vmem:[#allocation7 + $0x2a0] sm:$0xff]  ;;  %v179_v62 = vld [vmem:[#allocation7 + $0x2a8] sm:$0xff]  ;;  %v180_v63 = vld [vmem:[#allocation7 + $0x2b0] sm:$0xff] }
  0x41   :  { %538 = vmatpush.msra.mxu3 %v153_v12  ;;  %479 = vmatpush.msra.mxu0 %v142_v13  ;;  %v181_v0 = vld [vmem:[#allocation7 + $0x2b8] sm:$0xff]  ;;  %v170_v1 = vld [vmem:[#allocation7 + $0x260] sm:$0xff]  ;;  %v171_v2 = vld [vmem:[#allocation7 + $0x268] sm:$0xff] }
  0x42   :  { %499 = vmatpush.msra.mxu1 %v143_v14  ;;  %519 = vmatpush.msra.mxu2 %v144_v15  ;;  %v172_v3 = vld [vmem:[#allocation7 + $0x270] sm:$0xff]  ;;  %v173_v4 = vld [vmem:[#allocation7 + $0x278] sm:$0xff]  ;;  %v162_v5 = vld [vmem:[#allocation7 + $0x220] sm:$0xff] }
  0x43   :  { %539 = vmatpush.msra.mxu3 %v145_v16  ;;  %480 = vmatpush.msra.mxu0 %v134_v17  ;;  %v163_v6 = vld [vmem:[#allocation7 + $0x228] sm:$0xff]  ;;  %v164_v7 = vld [vmem:[#allocation7 + $0x230] sm:$0xff]  ;;  %v165_v8 = vld [vmem:[#allocation7 + $0x238] sm:$0xff] }
  0x44   :  { %500 = vmatpush.msra.mxu1 %v135_v18  ;;  %520 = vmatpush.msra.mxu2 %v136_v19  ;;  %v154_v9 = vld [vmem:[#allocation7 + $0x1e0] sm:$0xff]  ;;  %v155_v10 = vld [vmem:[#allocation7 + $0x1e8] sm:$0xff]  ;;  %v156_v11 = vld [vmem:[#allocation7 + $0x1f0] sm:$0xff] }
  0x45   :  { %540 = vmatpush.msra.mxu3 %v137_v20  ;;  %481 = vmatpush.msra.mxu0 %v126_v21  ;;  %v157_v12 = vld [vmem:[#allocation7 + $0x1f8] sm:$0xff]  ;;  %v146_v13 = vld [vmem:[#allocation7 + $0x1a0] sm:$0xff]  ;;  %v147_v14 = vld [vmem:[#allocation7 + $0x1a8] sm:$0xff] }
  0x46   :  { %501 = vmatpush.msra.mxu1 %v127_v22  ;;  %521 = vmatpush.msra.mxu2 %v128_v23  ;;  %v148_v15 = vld [vmem:[#allocation7 + $0x1b0] sm:$0xff]  ;;  %v149_v16 = vld [vmem:[#allocation7 + $0x1b8] sm:$0xff]  ;;  %v138_v17 = vld [vmem:[#allocation7 + $0x160] sm:$0xff] }
  0x47   :  { %541 = vmatpush.msra.mxu3 %v129_v24  ;;  %482 = vmatpush.msra.mxu0 %v118_v25  ;;  %v139_v18 = vld [vmem:[#allocation7 + $0x168] sm:$0xff]  ;;  %v140_v19 = vld [vmem:[#allocation7 + $0x170] sm:$0xff]  ;;  %v141_v20 = vld [vmem:[#allocation7 + $0x178] sm:$0xff] }
  0x48   :  { %502 = vmatpush.msra.mxu1 %v119_v26  ;;  %522 = vmatpush.msra.mxu2 %v120_v27  ;;  %v93_v21 = vld [vmem:[#allocation2] sm:$0xff]  ;;  %v130_v22 = vld [vmem:[#allocation7 + $0x120] sm:$0xff]  ;;  %v131_v23 = vld [vmem:[#allocation7 + $0x128] sm:$0xff] }
  0x49   :  { %542 = vmatpush.msra.mxu3 %v121_v28  ;;  %483 = vmatpush.msra.mxu0 %v110_v29  ;;  %v132_v24 = vld [vmem:[#allocation7 + $0x130] sm:$0xff]  ;;  %v133_v25 = vld [vmem:[#allocation7 + $0x138] sm:$0xff]  ;;  %v122_v26 = vld [vmem:[#allocation7 + $0xe0] sm:$0xff] }
  0x4a   :  { %503 = vmatpush.msra.mxu1 %v111_v30  ;;  %523 = vmatpush.msra.mxu2 %v112_v31  ;;  %v123_v27 = vld [vmem:[#allocation7 + $0xe8] sm:$0xff]  ;;  %v124_v28 = vld [vmem:[#allocation7 + $0xf0] sm:$0xff]  ;;  %v125_v29 = vld [vmem:[#allocation7 + $0xf8] sm:$0xff] }
  0x4b   :  { %543 = vmatpush.msra.mxu3 %v113_v32  ;;  %484 = vmatpush.msra.mxu0 %v102_v33  ;;  %v114_v30 = vld [vmem:[#allocation7 + $0xa0] sm:$0xff]  ;;  %v115_v31 = vld [vmem:[#allocation7 + $0xa8] sm:$0xff]  ;;  %v116_v32 = vld [vmem:[#allocation7 + $0xb0] sm:$0xff] }
  0x4c   :  { %504 = vmatpush.msra.mxu1 %v103_v34  ;;  %524 = vmatpush.msra.mxu2 %v104_v35  ;;  %v117_v33 = vld [vmem:[#allocation7 + $0xb8] sm:$0xff]  ;;  %v106_v34 = vld [vmem:[#allocation7 + $0x60] sm:$0xff]  ;;  %v107_v35 = vld [vmem:[#allocation7 + $0x68] sm:$0xff] }
  0x4d   :  { %544 = vmatpush.msra.mxu3 %v105_v36  ;;  %485 = vmatpush.msra.mxu0 %v94_v37  ;;  %v108_v36 = vld [vmem:[#allocation7 + $0x70] sm:$0xff]  ;;  %v109_v37 = vld [vmem:[#allocation7 + $0x78] sm:$0xff] }
  0x4e   :  { %505 = vmatpush.msra.mxu1 %v95_v38  ;;  %525 = vmatpush.msra.mxu2 %v96_v39  ;;  %v98_v38 = vld [vmem:[#allocation7 + $0x20] sm:$0xff]  ;;  %v99_v39 = vld [vmem:[#allocation7 + $0x28] sm:$0xff] }
  0x4f   :  { %545 = vmatpush.msra.mxu3 %v97_v40  ;;  %550 = vmatpush.msrb.mxu0 %v218_v41  ;;  %v100_v40 = vld [vmem:[#allocation7 + $0x30] sm:$0xff]  ;;  %v101_v41 = vld [vmem:[#allocation7 + $0x38] sm:$0xff] }
  0x50   :  { %570 = vmatpush.msrb.mxu1 %v219_v42  ;;  %590 = vmatpush.msrb.mxu2 %v220_v43 }
  0x51   :  { %610 = vmatpush.msrb.mxu3 %v221_v44  ;;  %551 = vmatpush.msrb.mxu0 %v210_v45 }
  0x52   :  { %571 = vmatpush.msrb.mxu1 %v211_v46  ;;  %591 = vmatpush.msrb.mxu2 %v212_v47 }
  0x53   :  { %611 = vmatpush.msrb.mxu3 %v213_v48  ;;  %552 = vmatpush.msrb.mxu0 %v202_v49 }
  0x54   :  { %572 = vmatpush.msrb.mxu1 %v203_v50  ;;  %592 = vmatpush.msrb.mxu2 %v204_v51 }
  0x55   :  { %612 = vmatpush.msrb.mxu3 %v205_v52  ;;  %553 = vmatpush.msrb.mxu0 %v194_v53 }
  0x56   :  { %573 = vmatpush.msrb.mxu1 %v195_v54  ;;  %593 = vmatpush.msrb.mxu2 %v196_v55 }
  0x57   :  { %613 = vmatpush.msrb.mxu3 %v197_v56  ;;  %554 = vmatpush.msrb.mxu0 %v186_v57 }
  0x58   :  { %574 = vmatpush.msrb.mxu1 %v187_v58  ;;  %594 = vmatpush.msrb.mxu2 %v188_v59 }
  0x59   :  { %614 = vmatpush.msrb.mxu3 %v189_v60  ;;  %555 = vmatpush.msrb.mxu0 %v178_v61 }
  0x5a   :  { %575 = vmatpush.msrb.mxu1 %v179_v62  ;;  %595 = vmatpush.msrb.mxu2 %v180_v63 }
  0x5b   :  { %615 = vmatpush.msrb.mxu3 %v181_v0  ;;  %556 = vmatpush.msrb.mxu0 %v170_v1  ;;  %v3344_v1 = vmov 683565275  }
  0x5c   :  { %576 = vmatpush.msrb.mxu1 %v171_v2  ;;  %596 = vmatpush.msrb.mxu2 %v172_v3  ;;  %v3342_v3 = vmov 2475754826  }
  0x5d   :  { %616 = vmatpush.msrb.mxu3 %v173_v4  ;;  %557 = vmatpush.msrb.mxu0 %v162_v5  ;;  %v3340_v5 = vmov 2131351028  }
  0x5e   :  { %577 = vmatpush.msrb.mxu1 %v163_v6  ;;  %597 = vmatpush.msrb.mxu2 %v164_v7  ;;  %v3338_v7 = vmov 2102212464  }
  0x5f   :  { %617 = vmatpush.msrb.mxu3 %v165_v8  ;;  %558 = vmatpush.msrb.mxu0 %v154_v9  ;;  %v3336_v9 = vmov 920167782  }
  0x60   :  { %578 = vmatpush.msrb.mxu1 %v155_v10  ;;  %598 = vmatpush.msrb.mxu2 %v156_v11 }
  0x61   :  { %618 = vmatpush.msrb.mxu3 %v157_v12  ;;  %559 = vmatpush.msrb.mxu0 %v146_v13 }
  0x62   :  { %579 = vmatpush.msrb.mxu1 %v147_v14  ;;  %599 = vmatpush.msrb.mxu2 %v148_v15 }
  0x63   :  { %619 = vmatpush.msrb.mxu3 %v149_v16  ;;  %560 = vmatpush.msrb.mxu0 %v138_v17 }
  0x64   :  { %580 = vmatpush.msrb.mxu1 %v139_v18  ;;  %600 = vmatpush.msrb.mxu2 %v140_v19  ;;  %v3334_v19 = vmov 1326507024  }
  0x65   :  { %620 = vmatpush.msrb.mxu3 %v141_v20  ;;  %486 = vmatmul.f32.vlgmr.msra.gmra.mxu0 %v93_v21 }
  0x66   :  { %506 = vmatmul.f32.vlgmr.msra.gmra.mxu1 %v93_v21  ;;  %526 = vmatmul.f32.vlgmr.msra.gmra.mxu2 %v93_v21 }
  0x67   :  { %546 = vmatmul.f32.vlgmr.msra.gmra.mxu3 %v93_v21  ;;  %561 = vmatpush.msrb.mxu0 %v130_v22 }
  0x68   :  { %581 = vmatpush.msrb.mxu1 %v131_v23  ;;  %601 = vmatpush.msrb.mxu2 %v132_v24 }
  0x69   :  { %621 = vmatpush.msrb.mxu3 %v133_v25  ;;  %562 = vmatpush.msrb.mxu0 %v122_v26 }
  0x6a   :  { %582 = vmatpush.msrb.mxu1 %v123_v27  ;;  %602 = vmatpush.msrb.mxu2 %v124_v28 }
  0x6b   :  { %622 = vmatpush.msrb.mxu3 %v125_v29  ;;  %563 = vmatpush.msrb.mxu0 %v114_v30 }
  0x6c   :  { %583 = vmatpush.msrb.mxu1 %v115_v31  ;;  %603 = vmatpush.msrb.mxu2 %v116_v32 }
  0x6d   :  { %623 = vmatpush.msrb.mxu3 %v117_v33  ;;  %564 = vmatpush.msrb.mxu0 %v106_v34 }
  0x6e   :  { %584 = vmatpush.msrb.mxu1 %v107_v35  ;;  %604 = vmatpush.msrb.mxu2 %v108_v36 }
  0x6f   :  { %624 = vmatpush.msrb.mxu3 %v109_v37  ;;  %565 = vmatpush.msrb.mxu0 %v98_v38 }
  0x70   :  { %585 = vmatpush.msrb.mxu1 %v99_v39  ;;  %605 = vmatpush.msrb.mxu2 %v100_v40 }
  0x71   :  { %625 = vmatpush.msrb.mxu3 %v101_v41  ;;  %566 = vmatmul.f32.vlgmr.msrb.gmra.mxu0 %v93_v21 }
  0x72   :  { %586 = vmatmul.f32.vlgmr.msrb.gmra.mxu1 %v93_v21  ;;  %606 = vmatmul.f32.vlgmr.msrb.gmra.mxu2 %v93_v21 }
  0x73   :  { %626 = vmatmul.f32.vlgmr.msrb.gmra.mxu3 %v93_v21 }
  0x9e   :  { %v2188_v42 = vpop.f32.mrf.mxu0 }
  0x9f   :  { %3361 = vst [vmem:[#allocation16_spill] sm:$0xff] %v2188_v42  ;;  %v2190_v43 = vpop.f32.mrf.mxu1  ;;  %v630_v44 = vand.u32 2147483647, %v2188_v42  ;;  %v633_v45 = vand.u32 2139095040, %v2188_v42 }
  0xa0   :  { %3362 = vst [vmem:[#allocation17_spill] sm:$0xff] %v2190_v43  ;;  %v785_v46 = vand.u32 2147483647, %v2190_v43  ;;  %v788_v47 = vand.u32 2139095040, %v2190_v43 }
  0xa1   :  { %v634_v48 = vshrl.u32 %v633_v45, 23  ;;  %v637_v49 = vand.u32 8388607, %v630_v44 }
  0xa2   :  { %v789_v50 = vshrl.u32 %v788_v47, 23  ;;  %v792_v54 = vand.u32 8388607, %v785_v46 }
  0xa3   :  { %v1921_v51 = vadd.s32 4294967169, %v634_v48  ;;  %v638_v52 = vor.u32 8388608, %v637_v49 }
  0xa4   :  { %v1924_v53 = vadd.s32 4294967169, %v789_v50  ;;  %v793_v59 = vor.u32 8388608, %v792_v54 }
  0xa5   :  { %v640_v55 = vadd.s32 1, %v1921_v51  ;;  %v2200_v58 = vshll.u32 %v638_v52, 8  ;;  %v2218_v17 = vpop.f32.mrf.mxu2 }
  0xa6   :  { %v795_v56 = vadd.s32 1, %v1924_v53  ;;  %v2212_v12 = vshll.u32 %v793_v59, 8  ;;  %3363 = vst [vmem:[#allocation18_spill] sm:$0xff] %v2218_v17  ;;  %v943_v27 = vand.u32 2139095040, %v2218_v17 }
  0xa7   :  { %vm641_vm2 = vcmp.gt.s32.totalorder %v640_v55, 0  ;;  %v679_v11 = vand.u32 65535, %v2200_v58  ;;  %v680_v16 = vshrl.u32 %v2200_v58, 16 }
  0xa8   :  { %v642_v57 = vsel %vm641_vm2, %v640_v55, 0  ;;  %vm796_vm3 = vcmp.gt.s32.totalorder %v795_v56, 0  ;;  %v2258_v45 = vand.u32 65535, %v2212_v12 }
  0xa9   :  { %v644_v60 = vand.u32 31, %v642_v57  ;;  %v797_v61 = vsel %vm796_vm3, %v795_v56, 0  ;;  %v2202_v62 = vshrl.u32 %v642_v57, 5 }
  0xaa   :  { %v2204_v63 = vand.u32 31, %v797_v61  ;;  %v2264_v53 = vshrl.u32 %v797_v61, 5 }
  0xab   :  { %v645_v0 = vsub.s32 32, %v644_v60  ;;  %v647_v2 = vshll.u32 %v3344_v1, %v644_v60  ;;  %v650_v4 = vshll.u32 %v3342_v3, %v644_v60  ;;  %v653_v6 = vshll.u32 %v3340_v5, %v644_v60 }
  0xac   :  { %v656_v8 = vshll.u32 %v3338_v7, %v644_v60  ;;  %v659_v10 = vshll.u32 %v3336_v9, %v644_v60  ;;  %vm662_vm4 = vcmp.lt.s32.totalorder %v2202_v62, 1  ;;  %vm665_vm5 = vcmp.lt.s32.totalorder %v2202_v62, 4 }
  0xad   :  { %v648_v13 = vshrl.u32 %v3342_v3, %v645_v0  ;;  %v651_v14 = vshrl.u32 %v3340_v5, %v645_v0  ;;  %v654_v15 = vshrl.u32 %v3338_v7, %v645_v0  ;;  %v657_v18 = vshrl.u32 %v3336_v9, %v645_v0 }
  0xae   :  { %v660_v20 = vshrl.u32 %v3334_v19, %v645_v0  ;;  %v2225_v24 = vsub.s32 32, %v2204_v63  ;;  %vm664_vm6 = vcmp.lt.s32.totalorder %v2202_v62, 3  ;;  %v646_v28 = vshrl.u32 %v3344_v1, %v645_v0 }
  0xaf   :  { %v649_v21 = vor.u32 %v648_v13, %v647_v2  ;;  %v652_v22 = vor.u32 %v651_v14, %v650_v4  ;;  %v655_v23 = vor.u32 %v654_v15, %v653_v6  ;;  %v658_v25 = vor.u32 %v657_v18, %v656_v8 }
  0xb0   :  { %v661_v26 = vor.u32 %v660_v20, %v659_v10  ;;  %vm663_vm7 = vcmp.lt.s32.totalorder %v2202_v62, 2  ;;  %v802_v33 = vshll.u32 %v3344_v1, %v2204_v63  ;;  %v805_v34 = vshll.u32 %v3342_v3, %v2204_v63 }
  0xb1   :  { %v670_v29 = vsel %vm662_vm4, %v649_v21, %v652_v22  ;;  %v674_v30 = vsel %vm662_vm4, %v652_v22, %v655_v23  ;;  %v671_v31 = vsel %vm665_vm5, %v658_v25, 920167782  ;;  %v667_v35 = vsel %vm665_vm5, %v655_v23, 2102212464 }
  0xb2   :  { %v675_v32 = vsel %vm665_vm5, %v661_v26, 1326507024  ;;  %v672_v36 = vsel %vm664_vm6, %v655_v23, %v671_v31  ;;  %v803_v38 = vshrl.u32 %v3342_v3, %v2225_v24  ;;  %v806_v41 = vshrl.u32 %v3340_v5, %v2225_v24 }
  0xb3   :  { %v676_v37 = vsel %vm664_vm6, %v658_v25, %v675_v32  ;;  %v673_v39 = vsel %vm663_vm7, %v670_v29, %v672_v36  ;;  %v666_v51 = vsel %vm662_vm4, %v646_v28, %v649_v21  ;;  %v668_v52 = vsel %vm664_vm6, %v652_v22, %v667_v35 }
  0xb4   :  { %v677_v40 = vsel %vm663_vm7, %v674_v30, %v676_v37  ;;  %v703_v49 = vand.u32 65535, %v673_v39  ;;  %v704_v50 = vshrl.u32 %v673_v39, 16  ;;  %v2266_v54 = vor.u32 %v803_v38, %v802_v33 }
  0xb5   :  { %v681_v47 = vand.u32 65535, %v677_v40  ;;  %v682_v48 = vshrl.u32 %v677_v40, 16  ;;  %v2268_v57 = vor.u32 %v806_v41, %v805_v34  ;;  %v808_v59 = vshll.u32 %v3340_v5, %v2204_v63 }
  0xb6   :  { %v706_v0 = vmul.u32 %v704_v50, %v679_v11  ;;  %v707_v2 = vmul.u32 %v703_v49, %v680_v16  ;;  %v809_v4 = vshrl.u32 %v3338_v7, %v2225_v24  ;;  %v705_v10 = vmul.u32 %v703_v49, %v679_v11 }
  0xb7   :  { %v684_v55 = vmul.u32 %v682_v48, %v679_v11  ;;  %v685_v56 = vmul.u32 %v681_v47, %v680_v16  ;;  %v683_v60 = vmul.u32 %v681_v47, %v679_v11  ;;  %v686_v6 = vmul.u32 %v682_v48, %v680_v16 }
  0xb8   :  { %v708_v61 = vmul.u32 %v704_v50, %v680_v16  ;;  %v709_v18 = vshll.u32 %v706_v0, 16  ;;  %v711_v21 = vshll.u32 %v707_v2, 16  ;;  %v811_v22 = vshll.u32 %v3338_v7, %v2204_v63 }
  0xb9   :  { %v687_v8 = vshll.u32 %v684_v55, 16  ;;  %v688_v13 = vshrl.u32 %v684_v55, 16  ;;  %v689_v14 = vshll.u32 %v685_v56, 16  ;;  %v690_v15 = vshrl.u32 %v685_v56, 16 }
  0xba   :  { %v3346_v23 = vmov 0   ;;  %vm713_vm9 = vc.u32 %v705_v10, %v709_v18  ;;  %v715_v26 = vadd.s32 %v709_v18, %v705_v10  ;;  %v812_v28 = vshrl.u32 %v3336_v9, %v2225_v24 }
  0xbb   :  { %vm691_vm8 = vc.u32 %v683_v60, %v687_v8  ;;  %v693_v20 = vadd.s32 %v687_v8, %v683_v60  ;;  %v714_v16 = vsel %vm713_vm9, 1, %v3346_v23  ;;  %v814_v29 = vshll.u32 %v3336_v9, %v2204_v63 }
  0xbc   :  { %v692_v25 = vsel %vm691_vm8, 1, %v3346_v23  ;;  %v716_v31 = vadd.s32 %v714_v16, %v708_v61  ;;  %vm717_vm11 = vc.u32 %v715_v26, %v711_v21  ;;  %v810_v32 = vor.u32 %v809_v4, %v808_v59 }
  0xbd   :  { %v694_v11 = vadd.s32 %v692_v25, %v686_v6  ;;  %vm695_vm10 = vc.u32 %v693_v20, %v689_v14  ;;  %v718_v34 = vsel %vm717_vm11, 1, %v3346_v23  ;;  %v813_v35 = vor.u32 %v812_v28, %v811_v22 }
  0xbe   :  { %v696_v30 = vsel %vm695_vm10, 1, %v3346_v23  ;;  %v815_v36 = vshrl.u32 %v3334_v19, %v2225_v24  ;;  %v710_v37 = vshrl.u32 %v706_v0, 16  ;;  %v720_v38 = vadd.s32 %v718_v34, %v716_v31 }
  0xbf   :  { %v698_v33 = vadd.s32 %v696_v30, %v694_v11  ;;  %vm817_vm12 = vcmp.lt.s32.totalorder %v2264_v53, 1  ;;  %vm819_vm13 = vcmp.lt.s32.totalorder %v2264_v53, 3  ;;  %vm818_vm14 = vcmp.lt.s32.totalorder %v2264_v53, 2 }
  0xc0   :  { %v816_v63 = vor.u32 %v815_v36, %v814_v29  ;;  %vm820_vm15 = vcmp.lt.s32.totalorder %v2264_v53, 4  ;;  %v712_v40 = vshrl.u32 %v707_v2, 16  ;;  %v721_v41 = vadd.s32 %v720_v38, %v710_v37 }
  0xc1   :  { %v699_v39 = vadd.s32 %v698_v33, %v688_v13  ;;  %v825_v47 = vsel %vm817_vm12, %v2266_v54, %v2268_v57  ;;  %v826_v48 = vsel %vm820_vm15, %v813_v35, 920167782  ;;  %v2298_v50 = vadd.s32 %v715_v26, %v711_v21 }
  0xc2   :  { %v827_v55 = vsel %vm819_vm13, %v810_v32, %v826_v48  ;;  %v829_v56 = vsel %vm817_vm12, %v2268_v57, %v810_v32  ;;  %v669_v59 = vsel %vm663_vm7, %v666_v51, %v668_v52  ;;  %v722_v60 = vadd.s32 %v721_v41, %v712_v40 }
  0xc3   :  { %v2296_v49 = vadd.s32 %v699_v39, %v690_v15  ;;  %v828_v0 = vsel %vm818_vm14, %v825_v47, %v827_v55  ;;  %v830_v2 = vsel %vm820_vm15, %v816_v63, 1326507024  ;;  %v835_v6 = vshrl.u32 %v2212_v12, 16 }
  0xc4   :  { %v831_v4 = vsel %vm819_vm13, %v813_v35, %v830_v2  ;;  %v858_v8 = vand.u32 65535, %v828_v0  ;;  %v726_v10 = vadd.s32 1, %v722_v60  ;;  %v859_v51 = vshrl.u32 %v828_v0, 16 }
  0xc5   :  { %vm725_vm0 = vc.u32 %v2296_v49, %v2298_v50  ;;  %v832_v62 = vsel %vm818_vm14, %v829_v56, %v831_v4  ;;  %v944_v52 = vshrl.u32 %v943_v27, 23  ;;  %v723_v61 = vmul.u32 %v2200_v58, %v669_v59 }
  0xc6   :  { %v836_v13 = vand.u32 65535, %v832_v62  ;;  %v837_v14 = vshrl.u32 %v832_v62, 16  ;;  %v727_v15 = vsel %vm725_vm0, %v726_v10, %v722_v60  ;;  %v801_v18 = vshrl.u32 %v3344_v1, %v2225_v24 }
  0xc7   :  { %v861_v20 = vmul.u32 %v859_v51, %v2258_v45  ;;  %v862_v21 = vmul.u32 %v858_v8, %v835_v6  ;;  %v728_v22 = vadd.s32 %v727_v15, %v723_v61  ;;  %v822_v25 = vsel %vm820_vm15, %v810_v32, 2102212464 }
  0xc8   :  { %v839_v26 = vmul.u32 %v837_v14, %v2258_v45  ;;  %v840_v28 = vmul.u32 %v836_v13, %v835_v6  ;;  %v860_v27 = vmul.u32 %v858_v8, %v2258_v45  ;;  %v863_v11 = vmul.u32 %v859_v51, %v835_v6 }
  0xc9   :  { %v864_v58 = vshll.u32 %v861_v20, 16  ;;  %v1927_v16 = vadd.s32 4294967169, %v944_v52  ;;  %v729_v29 = vadd.s32 536870912, %v728_v22  ;;  %v838_v30 = vmul.u32 %v836_v13, %v2258_v45 }
  0xca   :  { %v841_v31 = vmul.u32 %v837_v14, %v835_v6  ;;  %v842_v24 = vshll.u32 %v839_v26, 16  ;;  %v844_v33 = vshll.u32 %v840_v28, 16  ;;  %v866_v34 = vshll.u32 %v862_v21, 16 }
  0xcb   :  { %vm868_vm1 = vc.u32 %v860_v27, %v864_v58  ;;  %v870_v35 = vadd.s32 %v864_v58, %v860_v27  ;;  %v2329_v36 = vshrl.u32 %v729_v29, 30  ;;  %v821_v38 = vsel %vm817_vm12, %v801_v18, %v2266_v54 }
  0xcc   :  { %vm846_vm2 = vc.u32 %v838_v30, %v842_v24  ;;  %v848_v32 = vadd.s32 %v842_v24, %v838_v30  ;;  %v869_v37 = vsel %vm868_vm1, 1, %v3346_v23  ;;  %v823_v40 = vsel %vm819_vm13, %v2268_v57, %v822_v25 }
  0xcd   :  { %v847_v39 = vsel %vm846_vm2, 1, %v3346_v23  ;;  %v871_v63 = vadd.s32 %v869_v37, %v863_v11  ;;  %vm872_vm3 = vc.u32 %v870_v35, %v866_v34  ;;  %v731_v45 = vshll.u32 %v2329_v36, 30 }
  0xce   :  { %v849_v41 = vadd.s32 %v847_v39, %v841_v31  ;;  %vm850_vm4 = vc.u32 %v848_v32, %v844_v33  ;;  %v865_v48 = vshrl.u32 %v861_v20, 16  ;;  %v873_v55 = vsel %vm872_vm3, 1, %v3346_v23 }
  0xcf   :  { %v851_v47 = vsel %vm850_vm4, 1, %v3346_v23  ;;  %v950_v56 = vadd.s32 1, %v1927_v16  ;;  %v2342_v59 = vsub.s32 %v728_v22, %v731_v45  ;;  %v843_v54 = vshrl.u32 %v839_v26, 16 }
  0xd0   :  { %v853_v60 = vadd.s32 %v851_v47, %v849_v41  ;;  %v875_v0 = vadd.s32 %v873_v55, %v871_v63  ;;  %v845_v2 = vshrl.u32 %v840_v28, 16  ;;  %v867_v4 = vshrl.u32 %v862_v21, 16 }
  0xd1   :  { %vm951_vm5 = vcmp.gt.s32.totalorder %v950_v56, 0  ;;  %vm733_vm6 = vcmp.lt.s32.totalorder %v2342_v59, 0  ;;  %v734_v57 = vsub.s32 0, %v2342_v59  ;;  %v824_v10 = vsel %vm818_vm14, %v821_v38, %v823_v40 }
  0xd2   :  { %v854_v6 = vadd.s32 %v853_v60, %v843_v54  ;;  %v876_v8 = vadd.s32 %v875_v0, %v865_v48  ;;  %v940_v62 = vand.u32 2147483647, %v2218_v17  ;;  %v952_v51 = vsel %vm951_vm5, %v950_v56, 0 }
  0xd3   :  { %v735_v52 = vsel %vm733_vm6, %v734_v57, %v2342_v59  ;;  %v2352_v13 = vadd.s32 %v870_v35, %v866_v34  ;;  %v954_v18 = vand.u32 31, %v952_v51  ;;  %v878_v53 = vmul.u32 %v2212_v12, %v824_v10 }
  0xd4   :  { %v2350_v61 = vadd.s32 %v854_v6, %v845_v2  ;;  %v877_v14 = vadd.s32 %v876_v8, %v867_v4  ;;  %v736_v15 = vclz %v735_v52  ;;  %v947_v26 = vand.u32 8388607, %v940_v62  ;;  %v2402_v8 = vpop.f32.mrf.mxu3 }
  0xd5   :  { %v2357_v22 = vsub.s32 32, %v954_v18  ;;  %v2361_v28 = vshrl.u32 %v952_v51, 5  ;;  %v966_v58 = vshll.u32 %v3338_v7, %v954_v18  ;;  %v957_v33 = vshll.u32 %v3344_v1, %v954_v18  ;;  %3364 = vst [vmem:[#allocation19_spill] sm:$0xff] %v2402_v8 }
  0xd6   :  { %vm880_vm7 = vc.u32 %v2350_v61, %v2352_v13  ;;  %v881_v20 = vadd.s32 1, %v877_v14  ;;  %v1922_v21 = vadd.s32 4294967294, %v736_v15  ;;  %v960_v34 = vshll.u32 %v3342_v3, %v954_v18 }
  0xd7   :  { %v958_v11 = vshrl.u32 %v3342_v3, %v2357_v22  ;;  %v961_v29 = vshrl.u32 %v3340_v5, %v2357_v22  ;;  %v964_v12 = vshrl.u32 %v3338_v7, %v2357_v22  ;;  %v967_v30 = vshrl.u32 %v3336_v9, %v2357_v22 }
  0xd8   :  { %v882_v25 = vsel %vm880_vm7, %v881_v20, %v877_v14  ;;  %vm1923_vm8 = vcmp.lt.s32.totalorder %v1922_v21, 0  ;;  %v963_v35 = vshll.u32 %v3340_v5, %v954_v18  ;;  %v970_v63 = vshrl.u32 %v3334_v19, %v2357_v22 }
  0xd9   :  { %v883_v27 = vadd.s32 %v882_v25, %v878_v53  ;;  %v739_v16 = vsel %vm1923_vm8, 0, %v1922_v21  ;;  %v968_v32 = vor.u32 %v967_v30, %v966_v58  ;;  %v2377_v38 = vor.u32 %v958_v11, %v957_v33 }
  0xda   :  { %v744_v31 = vsub.s32 4294967266, %v739_v16  ;;  %v2379_v39 = vor.u32 %v961_v29, %v960_v34  ;;  %v948_v40 = vor.u32 8388608, %v947_v26  ;;  %v965_v41 = vor.u32 %v964_v12, %v963_v35 }
  0xdb   :  { %v884_v24 = vadd.s32 536870912, %v883_v27  ;;  %v969_v47 = vshll.u32 %v3336_v9, %v954_v18  ;;  %vm975_vm9 = vcmp.lt.s32.totalorder %v2361_v28, 4  ;;  %v740_v55 = vsub.s32 32, %v739_v16 }
  0xdc   :  { %v745_v45 = vadd.s32 127, %v744_v31  ;;  %vm972_vm10 = vcmp.lt.s32.totalorder %v2361_v28, 1  ;;  %v981_v54 = vsel %vm975_vm9, %v968_v32, 920167782  ;;  %vm974_vm11 = vcmp.lt.s32.totalorder %v2361_v28, 3 }
  0xdd   :  { %v2375_v37 = vshrl.u32 %v884_v24, 30  ;;  %v971_v56 = vor.u32 %v970_v63, %v969_v47  ;;  %v980_v0 = vsel %vm972_vm10, %v2377_v38, %v2379_v39  ;;  %v724_v2 = vadd.s32 %v2298_v50, %v2296_v49 }
  0xde   :  { %v746_v4 = vshll.u32 %v745_v45, 23  ;;  %v982_v57 = vsel %vm974_vm11, %v965_v41, %v981_v54  ;;  %v2400_v6 = vshll.u32 %v948_v40, 8  ;;  %vm973_vm13 = vcmp.lt.s32.totalorder %v2361_v28, 2 }
  0xdf   :  { %v886_v48 = vshll.u32 %v2375_v37, 30  ;;  %v984_v51 = vsel %vm972_vm10, %v2379_v39, %v965_v41  ;;  %v742_v52 = vshrl.u32 %v724_v2, %v740_v55  ;;  %v983_v49 = vsel %vm973_vm13, %v980_v0, %v982_v57 }
  0xe0   :  { %v985_v50 = vsel %vm975_vm9, %v971_v56, 1326507024  ;;  %v741_v14 = vshll.u32 %v2342_v59, %v739_v16  ;;  %v1098_v20 = vand.u32 2139095040, %v2402_v8  ;;  %v747_v21 = vor.u32 4788187, %v746_v4 }
  0xe1   :  { %v2389_v60 = vsub.s32 %v883_v27, %v886_v48  ;;  %v986_v18 = vsel %vm974_vm11, %v968_v32, %v985_v50  ;;  %v1014_v26 = vshrl.u32 %v983_v49, 16  ;;  %v989_v27 = vand.u32 65535, %v2400_v6 }
  0xe2   :  { %v987_v25 = vsel %vm973_vm13, %v984_v51, %v986_v18  ;;  %v990_v11 = vshrl.u32 %v2400_v6, 16  ;;  %v743_v59 = vor.u32 %v742_v52, %v741_v14  ;;  %v1013_v12 = vand.u32 65535, %v983_v49 }
  0xe3   :  { %vm888_vm12 = vcmp.lt.s32.totalorder %v2389_v60, 0  ;;  %v889_v10 = vsub.s32 0, %v2389_v60  ;;  %v991_v58 = vand.u32 65535, %v987_v25  ;;  %v992_v29 = vshrl.u32 %v987_v25, 16 }
  0xe4   :  { %v1016_v24 = vmul.u32 %v1014_v26, %v989_v27  ;;  %v748_v33 = vand.u32 2147483647, %v747_v21  ;;  %v1099_v34 = vshrl.u32 %v1098_v20, 23  ;;  %v956_v32 = vshrl.u32 %v3344_v1, %v2357_v22 }
  0xe5   :  { %v890_v15 = vsel %vm888_vm12, %v889_v10, %v2389_v60  ;;  %v994_v30 = vmul.u32 %v992_v29, %v989_v27  ;;  %v995_v31 = vmul.u32 %v991_v58, %v990_v11  ;;  %v993_v63 = vmul.u32 %v991_v58, %v989_v27 }
  0xe6   :  { %v891_v53 = vclz %v890_v15  ;;  %v750_v40 = vcvt.s32.f32 %v743_v59  ;;  %v996_v48 = vmul.u32 %v992_v29, %v990_v11  ;;  %v1017_v55 = vmul.u32 %v1013_v12, %v990_v11 }
  0xe7   :  { %v997_v45 = vshll.u32 %v994_v30, 16  ;;  %v999_v56 = vshll.u32 %v995_v31, 16  ;;  %v1019_v0 = vshll.u32 %v1016_v24, 16  ;;  %v977_v4 = vsel %vm975_vm9, %v965_v41, 2102212464 }
  0xe8   :  { %v1925_v16 = vadd.s32 4294967294, %v891_v53  ;;  %v751_v2 = vmul.f32 %v750_v40, %v748_v33  ;;  %v1930_v10 = vadd.s32 4294967169, %v1099_v34  ;;  %v1015_v22 = vmul.u32 %v1013_v12, %v989_v27 }
  0xe9   :  { %vm1001_vm15 = vc.u32 %v993_v63, %v997_v45  ;;  %v1003_v54 = vadd.s32 %v997_v45, %v993_v63  ;;  %v1018_v52 = vmul.u32 %v1014_v26, %v990_v11  ;;  %v998_v14 = vshrl.u32 %v994_v30, 16 }
  0xea   :  { %vm1926_vm14 = vcmp.lt.s32.totalorder %v1925_v16, 0  ;;  %v1002_v57 = vsel %vm1001_vm15, 1, %v3346_v23  ;;  %v1021_v20 = vshll.u32 %v1017_v55, 16  ;;  %vm1023_vm1 = vc.u32 %v1015_v22, %v1019_v0 }
  0xeb   :  { %v894_v35 = vsel %vm1926_vm14, 0, %v1925_v16  ;;  %v1004_v51 = vadd.s32 %v1002_v57, %v996_v48  ;;  %vm1005_vm0 = vc.u32 %v1003_v54, %v999_v56  ;;  %v1025_v21 = vadd.s32 %v1019_v0, %v1015_v22 }
  0xec   :  { %v899_v47 = vsub.s32 4294967266, %v894_v35  ;;  %v895_v49 = vsub.s32 32, %v894_v35  ;;  %v1006_v15 = vsel %vm1005_vm0, 1, %v3346_v23  ;;  %vm632_vm2 = vcmp.lt.s32.totalorder %v2188_v42, 0 }
  0xed   :  { %v1008_v18 = vadd.s32 %v1006_v15, %v1004_v51  ;;  %v752_v53 = vxor.u32 2147483648, %v751_v2  ;;  %v879_v41 = vadd.s32 %v2352_v13, %v2350_v61  ;;  %v1024_v25 = vsel %vm1023_vm1, 1, %v3346_v23 }
  0xee   :  { %v900_v50 = vadd.s32 127, %v899_v47  ;;  %v976_v26 = vsel %vm972_vm10, %v956_v32, %v2377_v38  ;;  %v1026_v11 = vadd.s32 %v1024_v25, %v1018_v52  ;;  %vm1027_vm3 = vc.u32 %v1025_v21, %v1021_v20 }
  0xef   :  { %v1009_v27 = vadd.s32 %v1008_v18, %v998_v14  ;;  %v897_v58 = vshrl.u32 %v879_v41, %v895_v49  ;;  %v978_v29 = vsel %vm974_vm11, %v2379_v39, %v977_v4  ;;  %v1000_v59 = vshrl.u32 %v995_v31, 16 }
  0xf0   :  { %v1028_v16 = vsel %vm1027_vm3, 1, %v3346_v23  ;;  %v901_v12 = vshll.u32 %v900_v50, 23  ;;  %v1020_v30 = vshrl.u32 %v1016_v24, 16  ;;  %v1105_v13 = vadd.s32 1, %v1930_v10 }
  0xf1   :  { %v1030_v61 = vadd.s32 %v1028_v16, %v1026_v11  ;;  %v753_v33 = vsel %vm632_vm2, %v752_v53, %v751_v2  ;;  %v896_v38 = vshll.u32 %v2389_v60, %v894_v35  ;;  %v2443_v34 = vadd.s32 %v1009_v27, %v1000_v59 }
  0xf2   :  { %vm2447_vm4 = vcmp.le.f32.partialorder %v630_v44, 0.7853982  ;;  %v1022_v39 = vshrl.u32 %v1017_v55, 16  ;;  %v1095_v63 = vand.u32 2147483647, %v2402_v8  ;;  %v979_v45 = vsel %vm973_vm13, %v976_v26, %v978_v29 }
  0xf3   :  { %v1031_v31 = vadd.s32 %v1030_v61, %v1020_v30  ;;  %v898_v24 = vor.u32 %v897_v58, %v896_v38  ;;  %v2454_v40 = vadd.s32 %v1025_v21, %v1021_v20  ;;  %vm1106_vm5 = vcmp.gt.s32.totalorder %v1105_v13, 0  ;;  %v2502_v30 = vpop.f32.mrf.mxu0 }
  0xf4   :  { %v2459_v60 = vsel %vm2447_vm4, %v2188_v42, %v753_v33  ;;  %v902_v44 = vor.u32 4788187, %v901_v12  ;;  %v1107_v47 = vsel %vm1106_vm5, %v1105_v13, 0  ;;  %v754_v55 = vsub.s32 4, %v2329_v36 }
  0xf5   :  { %v1032_v35 = vadd.s32 %v1031_v31, %v1022_v39  ;;  %vm1035_vm6 = vc.u32 %v2443_v34, %v2454_v40  ;;  %v1109_v48 = vand.u32 31, %v1107_v47  ;;  %v1033_v28 = vmul.u32 %v2400_v6, %v979_v45 }
  0xf6   :  { %v2467_v54 = vmul.f32 %v2459_v60, %v2459_v60  ;;  %v905_v0 = vcvt.s32.f32 %v898_v24  ;;  %v1102_v2 = vand.u32 8388607, %v1095_v63  ;;  %v903_v57 = vand.u32 2147483647, %v902_v44 }
  0xf7   :  { %v1036_v56 = vadd.s32 1, %v1032_v35  ;;  %v2471_v4 = vsub.s32 32, %v1109_v48  ;;  %v1112_v51 = vshll.u32 %v3344_v1, %v1109_v48  ;;  %v1115_v22 = vshll.u32 %v3342_v3, %v1109_v48 }
  0xf8   :  { %v1121_v49 = vshll.u32 %v3338_v7, %v1109_v48  ;;  %v1124_v50 = vshll.u32 %v3336_v9, %v1109_v48  ;;  %v1103_v53 = vor.u32 8388608, %v1102_v2  ;;  %v2487_v41 = vshrl.u32 %v1107_v47, 5 }
  0xf9   :  { %v1037_v10 = vsel %vm1035_vm6, %v1036_v56, %v1032_v35  ;;  %v1113_v6 = vshrl.u32 %v3342_v3, %v2471_v4  ;;  %v1116_v14 = vshrl.u32 %v3340_v5, %v2471_v4  ;;  %v1119_v15 = vshrl.u32 %v3338_v7, %v2471_v4 }
  0xfa   :  { %v1038_v52 = vadd.s32 %v1037_v10, %v1033_v28  ;;  %v1122_v18 = vshrl.u32 %v3336_v9, %v2471_v4  ;;  %v1125_v20 = vshrl.u32 %v3334_v19, %v2471_v4  ;;  %v1118_v25 = vshll.u32 %v3340_v5, %v1109_v48 }
  0xfb   :  { %v2490_v26 = vor.u32 %v1113_v6, %v1112_v51  ;;  %v2492_v27 = vor.u32 %v1116_v14, %v1115_v22  ;;  %v2499_v16 = vsel %vm632_vm2, %v754_v55, %v2329_v36  ;;  %vm787_vm7 = vcmp.lt.s32.totalorder %v2190_v43, 0 }
  0xfc   :  { %v1039_v21 = vadd.s32 536870912, %v1038_v52  ;;  %v1123_v11 = vor.u32 %v1122_v18, %v1121_v49  ;;  %v1126_v58 = vor.u32 %v1125_v20, %v1124_v50  ;;  %v1120_v59 = vor.u32 %v1119_v15, %v1118_v25 }
  0xfd   :  { %v906_v12 = vmul.f32 %v905_v0, %v903_v57  ;;  %vm1127_vm8 = vcmp.lt.s32.totalorder %v2487_v41, 1  ;;  %vm1130_vm9 = vcmp.lt.s32.totalorder %v2487_v41, 4  ;;  %v2507_v13 = vshll.u32 %v1103_v53, 8 }
  0xfe   :  { %v2494_v29 = vshrl.u32 %v1039_v21, 30  ;;  %v766_v33 = vmul.f32 -0.00019511016, %v2467_v54  ;;  %v1135_v36 = vsel %vm1127_vm8, %v2490_v26, %v2492_v27  ;;  %v1136_v38 = vsel %vm1130_vm9, %v1123_v11, 920167782 }
  0xff   :  { %v1140_v39 = vsel %vm1130_vm9, %v1126_v58, 1326507024  ;;  %vm1129_vm10 = vcmp.lt.s32.totalorder %v2487_v41, 3  ;;  %v1139_v24 = vsel %vm1127_vm8, %v2492_v27, %v1120_v59  ;;  %v1253_v45 = vand.u32 2139095040, %v2502_v30 }
 0x100   :  { %v1041_v61 = vshll.u32 %v2494_v29, 30  ;;  %v907_v44 = vxor.u32 2147483648, %v906_v12  ;;  %vm1128_vm11 = vcmp.lt.s32.totalorder %v2487_v41, 2  ;;  %v1137_v35 = vsel %vm1129_vm10, %v1120_v59, %v1136_v38 }
 0x101   :  { %v1141_v47 = vsel %vm1129_vm10, %v1123_v11, %v1140_v39  ;;  %v1138_v55 = vsel %vm1128_vm11, %v1135_v36, %v1137_v35  ;;  %v1144_v28 = vand.u32 65535, %v2507_v13  ;;  %v1145_v0 = vshrl.u32 %v2507_v13, 16 }
 0x102   :  { %v2518_v31 = vsub.s32 %v1038_v52, %v1041_v61  ;;  %v1142_v56 = vsel %vm1128_vm11, %v1139_v24, %v1141_v47  ;;  %v1168_v2 = vand.u32 65535, %v1138_v55  ;;  %v1169_v57 = vshrl.u32 %v1138_v55, 16 }
 0x103   :  { %vm2540_vm13 = vcmp.le.f32.partialorder %v785_v46, 0.7853982  ;;  %v1146_v22 = vand.u32 65535, %v1142_v56  ;;  %v1147_v52 = vshrl.u32 %v1142_v56, 16  ;;  %v1254_v6 = vshrl.u32 %v1253_v45, 23 }
 0x104   :  { %vm1043_vm12 = vcmp.lt.s32.totalorder %v2518_v31, 0  ;;  %v1044_v48 = vsub.s32 0, %v2518_v31  ;;  %v767_v49 = vadd.f32 0.008332121, %v766_v33  ;;  %v909_v50 = vsub.s32 4, %v2375_v37 }
 0x105   :  { %v1171_v15 = vmul.u32 %v1169_v57, %v1144_v28  ;;  %v908_v18 = vsel %vm787_vm7, %v907_v44, %v906_v12  ;;  %v1149_v20 = vmul.u32 %v1147_v52, %v1144_v28  ;;  %v1150_v21 = vmul.u32 %v1146_v22, %v1145_v0 }
 0x106   :  { %v1045_v51 = vsel %vm1043_vm12, %v1044_v48, %v2518_v31  ;;  %v3332_v46 = vand.u32 2147483647, %v2502_v30  ;;  %v1170_v25 = vmul.u32 %v1168_v2, %v1144_v28  ;;  %v1172_v11 = vmul.u32 %v1168_v2, %v1145_v0 }
 0x107   :  { %v1046_v14 = vclz %v1045_v51  ;;  %v1174_v58 = vshll.u32 %v1171_v15, 16  ;;  %v1132_v61 = vsel %vm1130_vm9, %v1120_v59, 2102212464  ;;  %v1148_v36 = vmul.u32 %v1146_v22, %v1144_v28 }
 0x108   :  { %v1152_v33 = vshll.u32 %v1149_v20, 16  ;;  %v1933_v38 = vadd.s32 4294967169, %v1254_v6  ;;  %v1151_v39 = vmul.u32 %v1147_v52, %v1145_v0  ;;  %v1173_v24 = vmul.u32 %v1169_v57, %v1145_v0 }
 0x109   :  { %v1928_v53 = vadd.s32 4294967294, %v1046_v14  ;;  %vm1178_vm15 = vc.u32 %v1170_v25, %v1174_v58  ;;  %v1154_v45 = vshll.u32 %v1150_v21, 16  ;;  %v1111_v47 = vshrl.u32 %v3344_v1, %v2471_v4 }
 0x10a   :  { %vm1156_vm0 = vc.u32 %v1148_v36, %v1152_v33  ;;  %v1158_v12 = vadd.s32 %v1152_v33, %v1148_v36  ;;  %v1179_v44 = vsel %vm1178_vm15, 1, %v3346_v23  ;;  %v1176_v59 = vshll.u32 %v1172_v11, 16 }
 0x10b   :  { %vm1929_vm14 = vcmp.lt.s32.totalorder %v1928_v53, 0  ;;  %v1157_v48 = vsel %vm1156_vm0, 1, %v3346_v23  ;;  %v1180_v28 = vadd.s32 %v1174_v58, %v1170_v25  ;;  %v1181_v56 = vadd.s32 %v1179_v44, %v1173_v24 }
 0x10c   :  { %v2552_v35 = vsel %vm1929_vm14, 0, %v1928_v53  ;;  %v1159_v55 = vadd.s32 %v1157_v48, %v1151_v39  ;;  %vm1160_vm1 = vc.u32 %v1158_v12, %v1154_v45  ;;  %v2560_v0 = vsel %vm2540_vm13, %v2190_v43, %v908_v18 }
 0x10d   :  { %v1131_v2 = vsel %vm1127_vm8, %v1111_v47, %v2490_v26  ;;  %v1133_v4 = vsel %vm1129_vm10, %v2492_v27, %v1132_v61  ;;  %v1161_v57 = vsel %vm1160_vm1, 1, %v3346_v23  ;;  %v1153_v51 = vshrl.u32 %v1149_v20, 16 }
 0x10e   :  { %v1163_v22 = vadd.s32 %v1161_v57, %v1159_v55  ;;  %vm1182_vm2 = vc.u32 %v1180_v28, %v1176_v59  ;;  %v1260_v52 = vadd.s32 1, %v1933_v38  ;;  %v1054_v6 = vsub.s32 4294967266, %v2552_v35 }
 0x10f   :  { %v1155_v14 = vshrl.u32 %v1150_v21, 16  ;;  %v1175_v53 = vshrl.u32 %v1171_v15, 16  ;;  %v1183_v18 = vsel %vm1182_vm2, 1, %v3346_v23  ;;  %v1050_v25 = vsub.s32 32, %v2552_v35 }
 0x110   :  { %v1164_v58 = vadd.s32 %v1163_v22, %v1153_v51  ;;  %v1185_v26 = vadd.s32 %v1183_v18, %v1181_v56  ;;  %vm1261_vm3 = vcmp.gt.s32.totalorder %v1260_v52, 0  ;;  %v768_v36 = vmul.f32 %v767_v49, %v2467_v54 }
 0x111   :  { %v1034_v27 = vadd.s32 %v2454_v40, %v2443_v34  ;;  %v1134_v20 = vsel %vm1128_vm11, %v1131_v2, %v1133_v4  ;;  %v1262_v61 = vsel %vm1261_vm3, %v1260_v52, 0  ;;  %v1177_v21 = vshrl.u32 %v1172_v11, 16 }
 0x112   :  { %v2577_v33 = vadd.s32 %v1164_v58, %v1155_v14  ;;  %v1186_v15 = vadd.s32 %v1185_v26, %v1175_v53  ;;  %v1264_v38 = vand.u32 31, %v1262_v61  ;;  %v2581_v39 = vmul.f32 %v2560_v0, %v2560_v0 }
 0x113   :  { %v1055_v24 = vadd.s32 127, %v1054_v6  ;;  %v2583_v45 = vadd.s32 %v1180_v28, %v1176_v59  ;;  %v1257_v49 = vand.u32 8388607, %v3332_v46  ;;  %v1052_v34 = vshrl.u32 %v1034_v27, %v1050_v25 }
 0x114   :  { %v1187_v40 = vadd.s32 %v1186_v15, %v1177_v21  ;;  %v1188_v41 = vmul.u32 %v2507_v13, %v1134_v20  ;;  %v2588_v12 = vsub.s32 32, %v1264_v38  ;;  %v2592_v11 = vshrl.u32 %v1262_v61, 5 }
 0x115   :  { %vm1190_vm5 = vc.u32 %v2577_v33, %v2583_v45  ;;  %v1267_v44 = vshll.u32 %v3344_v1, %v1264_v38  ;;  %v1270_v47 = vshll.u32 %v3342_v3, %v1264_v38  ;;  %v1273_v13 = vshll.u32 %v3340_v5, %v1264_v38 }
 0x116   :  { %v1191_v48 = vadd.s32 1, %v1187_v40  ;;  %v1268_v59 = vshrl.u32 %v3342_v3, %v2588_v12  ;;  %v1271_v55 = vshrl.u32 %v3340_v5, %v2588_v12  ;;  %v1056_v28 = vshll.u32 %v1055_v24, 23 }
 0x117   :  { %v1274_v56 = vshrl.u32 %v3338_v7, %v2588_v12  ;;  %v1276_v2 = vshll.u32 %v3338_v7, %v1264_v38  ;;  %v1277_v4 = vshrl.u32 %v3336_v9, %v2588_v12  ;;  %v1279_v52 = vshll.u32 %v3336_v9, %v1264_v38 }
 0x118   :  { %v1192_v57 = vsel %vm1190_vm5, %v1191_v48, %v1187_v40  ;;  %v2606_v51 = vor.u32 %v1268_v59, %v1267_v44  ;;  %v2608_v22 = vor.u32 %v1271_v55, %v1270_v47  ;;  %v921_v6 = vmul.f32 -0.00019511016, %v2581_v39 }
 0x119   :  { %v1193_v14 = vadd.s32 %v1192_v57, %v1188_v41  ;;  %v1258_v53 = vor.u32 8388608, %v1257_v49  ;;  %v1278_v18 = vor.u32 %v1277_v4, %v1276_v2  ;;  %v1051_v25 = vshll.u32 %v2518_v31, %v2552_v35 }
 0x11a   :  { %v2614_v58 = vor.u32 %v1274_v56, %v1273_v13  ;;  %v1280_v26 = vshrl.u32 %v3334_v19, %v2588_v12  ;;  %vm1282_vm6 = vcmp.lt.s32.totalorder %v2592_v11, 1  ;;  %v1057_v27 = vor.u32 4788187, %v1056_v28 }
 0x11b   :  { %v1194_v20 = vadd.s32 536870912, %v1193_v14  ;;  %vm1284_vm8 = vcmp.lt.s32.totalorder %v2592_v11, 3  ;;  %vm1285_vm9 = vcmp.lt.s32.totalorder %v2592_v11, 4  ;;  %v769_v61 = vadd.f32 -0.16666654, %v768_v36 }
 0x11c   :  { %v1053_v21 = vor.u32 %v1052_v34, %v1051_v25  ;;  %v1281_v15 = vor.u32 %v1280_v26, %v1279_v52  ;;  %v1290_v31 = vsel %vm1282_vm6, %v2606_v51, %v2608_v22  ;;  %v922_v35 = vadd.f32 0.008332121, %v921_v6 }
 0x11d   :  { %v2625_v38 = vshrl.u32 %v1194_v20, 30  ;;  %v1291_v24 = vsel %vm1285_vm9, %v1278_v18, 920167782  ;;  %v2629_v49 = vshll.u32 %v1258_v53, 8  ;;  %vm1283_vm10 = vcmp.lt.s32.totalorder %v2592_v11, 2  ;;  %v2661_v53 = vpop.f32.mrf.mxu1 }
 0x11e   :  { %v1292_v36 = vsel %vm1284_vm8, %v2614_v58, %v1291_v24  ;;  %v1294_v34 = vsel %vm1282_vm6, %v2608_v22, %v2614_v58  ;;  %v1295_v40 = vsel %vm1285_vm9, %v1281_v15, 1326507024  ;;  %v2646_v41 = vsel %vm787_vm7, %v909_v50, %v2375_v37 }
 0x11f   :  { %v1058_v44 = vand.u32 2147483647, %v1057_v27  ;;  %v1196_v47 = vshll.u32 %v2625_v38, 30  ;;  %v1293_v48 = vsel %vm1283_vm10, %v1290_v31, %v1292_v36  ;;  %v770_v59 = vmul.f32 %v769_v61, %v2467_v54 }
 0x120   :  { %v1060_v55 = vcvt.s32.f32 %v1053_v21  ;;  %v1296_v13 = vsel %vm1284_vm8, %v1278_v18, %v1295_v40  ;;  %v1324_v28 = vshrl.u32 %v1293_v48, 16  ;;  %v1299_v37 = vand.u32 65535, %v2629_v49 }
 0x121   :  { %v2654_v56 = vsub.s32 %v1193_v14, %v1196_v47  ;;  %v1297_v2 = vsel %vm1283_vm10, %v1294_v34, %v1296_v13  ;;  %v1323_v50 = vand.u32 65535, %v1293_v48  ;;  %v923_v4 = vmul.f32 %v922_v35, %v2581_v39 }
 0x122   :  { %v1300_v57 = vshrl.u32 %v2629_v49, 16  ;;  %v1301_v52 = vand.u32 65535, %v1297_v2  ;;  %v1302_v6 = vshrl.u32 %v1297_v2, 16  ;;  %vm942_vm7 = vcmp.lt.s32.totalorder %v2218_v17, 0 }
 0x123   :  { %v1061_v18 = vmul.f32 %v1060_v55, %v1058_v44  ;;  %vm1198_vm11 = vcmp.lt.s32.totalorder %v2654_v56, 0  ;;  %v1199_v14 = vsub.s32 0, %v2654_v56  ;;  %v1326_v25 = vmul.u32 %v1324_v28, %v1299_v37 }
 0x124   :  { %v1304_v20 = vmul.u32 %v1302_v6, %v1299_v37  ;;  %v1305_v61 = vmul.u32 %v1301_v52, %v1300_v57  ;;  %v771_v21 = vadd.f32 1.0, %v770_v59  ;;  %v1327_v31 = vmul.u32 %v1323_v50, %v1300_v57 }
 0x125   :  { %v1200_v15 = vsel %vm1198_vm11, %v1199_v14, %v2654_v56  ;;  %v1408_v35 = vand.u32 2139095040, %v2661_v53  ;;  %v924_v24 = vadd.f32 -0.16666654, %v923_v4  ;;  %vm2676_vm12 = vcmp.le.f32.partialorder %v940_v62, 0.7853982 }
 0x126   :  { %v1201_v34 = vclz %v1200_v15  ;;  %v1303_v40 = vmul.u32 %v1301_v52, %v1299_v37  ;;  %v1307_v44 = vshll.u32 %v1304_v20, 16  ;;  %v1062_v47 = vxor.u32 2147483648, %v1061_v18 }
 0x127   :  { %v1306_v48 = vmul.u32 %v1302_v6, %v1300_v57  ;;  %v1325_v55 = vmul.u32 %v1323_v50, %v1299_v37  ;;  %v1329_v13 = vshll.u32 %v1326_v25, 16  ;;  %v1309_v2 = vshll.u32 %v1305_v61, 16 }
 0x128   :  { %v1931_v59 = vadd.s32 4294967294, %v1201_v34  ;;  %vm1311_vm14 = vc.u32 %v1303_v40, %v1307_v44  ;;  %v1313_v14 = vadd.s32 %v1307_v44, %v1303_v40  ;;  %v1328_v4 = vmul.u32 %v1324_v28, %v1300_v57 }
 0x129   :  { %v1312_v27 = vsel %vm1311_vm14, 1, %v3346_v23  ;;  %v1331_v26 = vshll.u32 %v1327_v31, 16  ;;  %vm1333_vm15 = vc.u32 %v1325_v55, %v1329_v13  ;;  %v1335_v37 = vadd.s32 %v1329_v13, %v1325_v55 }
 0x12a   :  { %vm1932_vm0 = vcmp.lt.s32.totalorder %v1931_v59, 0  ;;  %v1314_v62 = vadd.s32 %v1312_v27, %v1306_v48  ;;  %vm1315_vm1 = vc.u32 %v1313_v14, %v1309_v2  ;;  %v1334_v15 = vsel %vm1333_vm15, 1, %v3346_v23 }
 0x12b   :  { %v2682_v52 = vsel %vm1932_vm0, 0, %v1931_v59  ;;  %v1316_v6 = vsel %vm1315_vm1, 1, %v3346_v23  ;;  %v1336_v50 = vadd.s32 %v1334_v15, %v1328_v4  ;;  %v1063_v34 = vsel %vm942_vm7, %v1062_v47, %v1061_v18 }
 0x12c   :  { %v1266_v40 = vshrl.u32 %v3344_v1, %v2588_v12  ;;  %v1308_v28 = vshrl.u32 %v1304_v20, 16  ;;  %v1318_v57 = vadd.s32 %v1316_v6, %v1314_v62  ;;  %v1064_v44 = vsub.s32 4, %v2494_v29 }
 0x12d   :  { %v1287_v27 = vsel %vm1285_vm9, %v2614_v58, 2102212464  ;;  %vm1337_vm2 = vc.u32 %v1335_v37, %v1331_v26  ;;  %v1409_v48 = vshrl.u32 %v1408_v35, 23  ;;  %v1209_v59 = vsub.s32 4294967266, %v2682_v52 }
 0x12e   :  { %v1310_v55 = vshrl.u32 %v1305_v61, 16  ;;  %v1319_v13 = vadd.s32 %v1318_v57, %v1308_v28  ;;  %v1338_v2 = vsel %vm1337_vm2, 1, %v3346_v23  ;;  %v2698_v12 = vsel %vm2676_vm12, %v2218_v17, %v1063_v34 }
 0x12f   :  { %v1330_v18 = vshrl.u32 %v1326_v25, 16  ;;  %v1340_v20 = vadd.s32 %v1338_v2, %v1336_v50  ;;  %v1936_v47 = vadd.s32 4294967169, %v1409_v48  ;;  %v1286_v58 = vsel %vm1282_vm6, %v1266_v40, %v2606_v51 }
 0x130   :  { %v1288_v35 = vsel %vm1284_vm8, %v2608_v22, %v1287_v27  ;;  %v2706_v61 = vadd.s32 %v1319_v13, %v1310_v55  ;;  %v3331_v14 = vand.u32 2147483647, %v2661_v53  ;;  %v925_v4 = vmul.f32 %v924_v24, %v2581_v39 }
 0x131   :  { %v1332_v62 = vshrl.u32 %v1327_v31, 16  ;;  %v1341_v15 = vadd.s32 %v1340_v20, %v1330_v18  ;;  %v1415_v6 = vadd.s32 1, %v1936_v47  ;;  %v2712_v25 = vmul.f32 %v2698_v12, %v2698_v12 }
 0x132   :  { %v1205_v50 = vsub.s32 32, %v2682_v52  ;;  %v1210_v51 = vadd.s32 127, %v1209_v59  ;;  %v2715_v34 = vadd.s32 %v1335_v37, %v1331_v26  ;;  %v2718_v22 = vmul.f32 %v771_v21, %v2459_v60 }
 0x133   :  { %3371 = vst [vmem:[#allocation20_spill] sm:$0xff] %v2712_v25  ;;  %v1289_v40 = vsel %vm1283_vm10, %v1286_v58, %v1288_v35  ;;  %v1342_v28 = vadd.s32 %v1341_v15, %v1332_v62  ;;  %vm1416_vm3 = vcmp.gt.s32.totalorder %v1415_v6, 0  ;;  %v1189_v31 = vadd.s32 %v2583_v45, %v2577_v33 }
 0x134   :  { %3372 = vst [vmem:[#allocation21_spill] sm:$0xff] %v2718_v22  ;;  %vm1345_vm5 = vc.u32 %v2706_v61, %v2715_v34  ;;  %v1412_v24 = vand.u32 8388607, %v3331_v14  ;;  %v1417_v57 = vsel %vm1416_vm3, %v1415_v6, 0  ;;  %v926_v26 = vadd.f32 1.0, %v925_v4 }
 0x135   :  { %v2731_v60 = vsel %vm942_vm7, %v1064_v44, %v2494_v29  ;;  %v1346_v11 = vadd.s32 1, %v1342_v28  ;;  %v1419_v21 = vand.u32 31, %v1417_v57  ;;  %v1076_v37 = vmul.f32 -0.00019511016, %v2712_v25 }
 0x136   :  { %3373 = vst [vmem:[#allocation22_spill] sm:$0xff] %v2731_v60  ;;  %v1207_v27 = vshrl.u32 %v1189_v31, %v1205_v50  ;;  %v1211_v48 = vshll.u32 %v1210_v51, 23  ;;  %v1343_v33 = vmul.u32 %v2629_v49, %v1289_v40  ;;  %v1413_v18 = vor.u32 8388608, %v1412_v24 }
 0x137   :  { %v1347_v45 = vsel %vm1345_vm5, %v1346_v11, %v1342_v28  ;;  %v2735_v59 = vsub.s32 32, %v1419_v21  ;;  %v1422_v55 = vshll.u32 %v3344_v1, %v1419_v21  ;;  %v1425_v13 = vshll.u32 %v3342_v3, %v1419_v21 }
 0x138   :  { %v1348_v2 = vadd.s32 %v1347_v45, %v1343_v33  ;;  %v2739_v20 = vshrl.u32 %v1417_v57, 5  ;;  %v1431_v29 = vshll.u32 %v3338_v7, %v1419_v21  ;;  %v1428_v49 = vshll.u32 %v3340_v5, %v1419_v21 }
 0x139   :  { %v1423_v44 = vshrl.u32 %v3342_v3, %v2735_v59  ;;  %v1426_v47 = vshrl.u32 %v3340_v5, %v2735_v59  ;;  %v1429_v58 = vshrl.u32 %v3338_v7, %v2735_v59  ;;  %v1077_v35 = vadd.f32 0.008332121, %v1076_v37 }
 0x13a   :  { %v1206_v4 = vshll.u32 %v2654_v56, %v2682_v52  ;;  %v1349_v62 = vadd.s32 536870912, %v1348_v2  ;;  %v1432_v15 = vshrl.u32 %v3336_v9, %v2735_v59  ;;  %v1212_v6 = vor.u32 4788187, %v1211_v48  ;;  %v2766_v52 = vpop.f32.mrf.mxu2 }
 0x13b   :  { %v2753_v50 = vor.u32 %v1423_v44, %v1422_v55  ;;  %v2755_v51 = vor.u32 %v1426_v47, %v1425_v13  ;;  %v1434_v40 = vshll.u32 %v3336_v9, %v1419_v21  ;;  %v1435_v57 = vshrl.u32 %v3334_v19, %v2735_v59 }
 0x13c   :  { %v1208_v28 = vor.u32 %v1207_v27, %v1206_v4  ;;  %v2758_v31 = vshrl.u32 %v1349_v62, 30  ;;  %v1433_v24 = vor.u32 %v1432_v15, %v1431_v29  ;;  %v1430_v11 = vor.u32 %v1429_v58, %v1428_v49 }
 0x13d   :  { %vm1437_vm6 = vcmp.lt.s32.totalorder %v2739_v20, 1  ;;  %vm1440_vm8 = vcmp.lt.s32.totalorder %v2739_v20, 4  ;;  %v2764_v56 = vshll.u32 %v1413_v18, 8  ;;  %v2769_v37 = vmul.f32 %v926_v26, %v2560_v0 }
 0x13e   :  { %v1351_v27 = vshll.u32 %v2758_v31, 30  ;;  %vm1439_vm9 = vcmp.lt.s32.totalorder %v2739_v20, 3  ;;  %v1213_v48 = vand.u32 2147483647, %v1212_v6  ;;  %v1436_v33 = vor.u32 %v1435_v57, %v1434_v40 }
 0x13f   :  { %3374 = vst [vmem:[#allocation23_spill] sm:$0xff] %v2769_v37  ;;  %v1445_v45 = vsel %vm1437_vm6, %v2753_v50, %v2755_v51  ;;  %v1446_v55 = vsel %vm1440_vm8, %v1433_v24, 920167782  ;;  %v1078_v0 = vmul.f32 %v1077_v35, %v2712_v25  ;;  %v1215_v26 = vcvt.s32.f32 %v1208_v28 }
 0x140   :  { %v2783_v13 = vsub.s32 %v1348_v2, %v1351_v27  ;;  %v3333_v18 = vand.u32 2147483647, %v2766_v52  ;;  %vm1438_vm10 = vcmp.lt.s32.totalorder %v2739_v20, 2  ;;  %v1447_v29 = vsel %vm1439_vm9, %v1430_v11, %v1446_v55 }
 0x141   :  { %v1454_v44 = vand.u32 65535, %v2764_v56  ;;  %v1563_v47 = vand.u32 2139095040, %v2766_v52  ;;  %v1448_v58 = vsel %vm1438_vm10, %v1445_v45, %v1447_v29  ;;  %v1449_v2 = vsel %vm1437_vm6, %v2755_v51, %v1430_v11 }
 0x142   :  { %vm1353_vm7 = vcmp.lt.s32.totalorder %v2783_v13, 0  ;;  %v1354_v49 = vsub.s32 0, %v2783_v13  ;;  %v2798_v35 = vmul.f32 %v1215_v26, %v1213_v48  ;;  %v1450_v4 = vsel %vm1440_vm8, %v1436_v33, 1326507024 }
 0x143   :  { %v1478_v62 = vand.u32 65535, %v1448_v58  ;;  %v1479_v15 = vshrl.u32 %v1448_v58, 16  ;;  %v1451_v28 = vsel %vm1439_vm9, %v1433_v24, %v1450_v4  ;;  %v1455_v57 = vshrl.u32 %v2764_v56, 16 }
 0x144   :  { %v1355_v40 = vsel %vm1353_vm7, %v1354_v49, %v2783_v13  ;;  %v1452_v45 = vsel %vm1438_vm10, %v1449_v2, %v1451_v28  ;;  %v1564_v55 = vshrl.u32 %v1563_v47, 23  ;;  %v1079_v26 = vadd.f32 -0.16666654, %v1078_v0 }
 0x145   :  { %v1356_v27 = vclz %v1355_v40  ;;  %v2809_v48 = vmul.u32 %v1479_v15, %v1454_v44  ;;  %v1344_v33 = vadd.s32 %v2715_v34, %v2706_v61  ;;  %v1456_v29 = vand.u32 65535, %v1452_v45 }
 0x146   :  { %v1457_v58 = vshrl.u32 %v1452_v45, 16  ;;  %v1217_v49 = vxor.u32 2147483648, %v2798_v35  ;;  %v2814_v14 = vmul.u32 %v1478_v62, %v1455_v57  ;;  %v2818_v24 = vand.u32 8388607, %v3333_v18 }
 0x147   :  { %v1934_v21 = vadd.s32 4294967294, %v1356_v27  ;;  %v1421_v2 = vshrl.u32 %v3344_v1, %v2735_v59  ;;  %v1460_v47 = vmul.u32 %v1456_v29, %v1455_v57  ;;  %v1484_v0 = vshll.u32 %v2809_v48, 16 }
 0x148   :  { %v1459_v4 = vmul.u32 %v1457_v58, %v1454_v44  ;;  %v1442_v61 = vsel %vm1440_vm8, %v1430_v11, 2102212464  ;;  %v1480_v34 = vmul.u32 %v1478_v62, %v1454_v44  ;;  %v1939_v40 = vadd.s32 4294967169, %v1564_v55 }
 0x149   :  { %vm1935_vm11 = vcmp.lt.s32.totalorder %v1934_v21, 0  ;;  %v1458_v27 = vmul.u32 %v1456_v29, %v1454_v44  ;;  %v1483_v46 = vmul.u32 %v1479_v15, %v1455_v57  ;;  %v1461_v19 = vmul.u32 %v1457_v58, %v1455_v57 }
 0x14a   :  { %v1359_v28 = vsel %vm1935_vm11, 0, %v1934_v21  ;;  %v1462_v45 = vshll.u32 %v1459_v4, 16  ;;  %v1486_v9 = vshll.u32 %v2814_v14, 16  ;;  %vm1097_vm14 = vcmp.lt.s32.totalorder %v2402_v8, 0 }
 0x14b   :  { %v1360_v6 = vsub.s32 32, %v1359_v28  ;;  %v1364_v18 = vsub.s32 4294967266, %v1359_v28  ;;  %v1464_v59 = vshll.u32 %v1460_v47, 16  ;;  %vm1488_vm0 = vc.u32 %v1480_v34, %v1484_v0 }
 0x14c   :  { %vm1466_vm15 = vc.u32 %v1458_v27, %v1462_v45  ;;  %v1468_v7 = vadd.s32 %v1462_v45, %v1458_v27  ;;  %v1489_v21 = vsel %vm1488_vm0, 1, %v3346_v23  ;;  %v1490_v62 = vadd.s32 %v1484_v0, %v1480_v34 }
 0x14d   :  { %v1362_v5 = vshrl.u32 %v1344_v33, %v1360_v6  ;;  %v1365_v3 = vadd.s32 127, %v1364_v18  ;;  %v1467_v11 = vsel %vm1466_vm15, 1, %v3346_v23  ;;  %v1491_v15 = vadd.s32 %v1489_v21, %v1483_v46 }
 0x14e   :  { %v1469_v44 = vadd.s32 %v1467_v11, %v1461_v19  ;;  %vm1470_vm1 = vc.u32 %v1468_v7, %v1464_v59  ;;  %v1485_v29 = vshrl.u32 %v2809_v48, 16  ;;  %v1570_v58 = vadd.s32 1, %v1939_v40 }
 0x14f   :  { %v1366_v55 = vshll.u32 %v1365_v3, 23  ;;  %v1471_v57 = vsel %vm1470_vm1, 1, %v3346_v23  ;;  %v1361_v1 = vshll.u32 %v2783_v13, %v1359_v28  ;;  %v1463_v27 = vshrl.u32 %v1459_v4, 16 }
 0x150   :  { %v1473_v45 = vadd.s32 %v1471_v57, %v1469_v44  ;;  %vm1492_vm2 = vc.u32 %v1490_v62, %v1486_v9  ;;  %v1465_v6 = vshrl.u32 %v1460_v47, 16  ;;  %vm1571_vm3 = vcmp.gt.s32.totalorder %v1570_v58, 0 }
 0x151   :  { %v1367_v18 = vor.u32 4788187, %v1366_v55  ;;  %v1493_v33 = vsel %vm1492_vm2, 1, %v3346_v23  ;;  %v1363_v19 = vor.u32 %v1362_v5, %v1361_v1  ;;  %v1572_v46 = vsel %vm1571_vm3, %v1570_v58, 0 }
 0x152   :  { %v1474_v7 = vadd.s32 %v1473_v45, %v1463_v27  ;;  %v1495_v0 = vadd.s32 %v1493_v33, %v1491_v15  ;;  %v1080_v3 = vmul.f32 %v1079_v26, %v2712_v25  ;;  %vm2836_vm5 = vcmp.le.f32.partialorder %v1095_v63, 0.7853982 }
 0x153   :  { %v1441_v13 = vsel %vm1437_vm6, %v1421_v2, %v2753_v50  ;;  %v1443_v4 = vsel %vm1439_vm9, %v2755_v51, %v1442_v61  ;;  %v1574_v1 = vand.u32 31, %v1572_v46  ;;  %v1487_v47 = vshrl.u32 %v2814_v14, 16 }
 0x154   :  { %v2846_v5 = vadd.s32 %v1474_v7, %v1465_v6  ;;  %v1496_v26 = vadd.s32 %v1495_v0, %v1485_v29  ;;  %v1568_v34 = vor.u32 8388608, %v2818_v24  ;;  %v1218_v63 = vsel %vm1097_vm14, %v1217_v49, %v2798_v35 }
 0x155   :  { %v1368_v40 = vand.u32 2147483647, %v1367_v18  ;;  %v2853_v28 = vadd.s32 %v1490_v62, %v1486_v9  ;;  %v1575_v50 = vsub.s32 32, %v1574_v1  ;;  %v1370_v2 = vcvt.s32.f32 %v1363_v19 }
 0x156   :  { %v1444_v51 = vsel %vm1438_vm10, %v1441_v13, %v1443_v4  ;;  %v1497_v61 = vadd.s32 %v1496_v26, %v1487_v47  ;;  %v3377_v59 = vmov 683565275   ;;  %v3378_v14 = vmov 2475754826  }
 0x157   :  { %v1577_v11 = vshll.u32 %v3377_v59, %v1574_v1  ;;  %vm1500_vm6 = vc.u32 %v2846_v5, %v2853_v28  ;;  %v1578_v24 = vshrl.u32 %v3378_v14, %v1575_v50  ;;  %v1580_v21 = vshll.u32 %v3378_v14, %v1574_v1 }
 0x158   :  { %v3379_v44 = vmov 2131351028   ;;  %v1501_v49 = vadd.s32 1, %v1497_v61  ;;  %v3380_v9 = vmov 2102212464   ;;  %v1371_v57 = vmul.f32 %v1370_v2, %v1368_v40 }
 0x159   :  { %v1581_v35 = vshrl.u32 %v3379_v44, %v1575_v50  ;;  %v1584_v62 = vshrl.u32 %v3380_v9, %v1575_v50  ;;  %v1586_v15 = vshll.u32 %v3380_v9, %v1574_v1  ;;  %v3381_v55 = vmov 920167782  }
 0x15a   :  { %v1587_v20 = vshrl.u32 %v3381_v55, %v1575_v50  ;;  %v1498_v29 = vmul.u32 %v2764_v56, %v1444_v51  ;;  %v2867_v58 = vshrl.u32 %v1572_v46, 5  ;;  %v1583_v27 = vshll.u32 %v3379_v44, %v1574_v1 }
 0x15b   :  { %vm1252_vm8 = vcmp.lt.s32.totalorder %v2502_v30, 0  ;;  %v1502_v45 = vsel %vm1500_vm6, %v1501_v49, %v1497_v61  ;;  %v1579_v18 = vor.u32 %v1578_v24, %v1577_v11  ;;  %v1582_v6 = vor.u32 %v1581_v35, %v1580_v21 }
 0x15c   :  { %v1588_v33 = vor.u32 %v1587_v20, %v1586_v15  ;;  %v1503_v19 = vadd.s32 %v1502_v45, %v1498_v29  ;;  %v1585_v7 = vor.u32 %v1584_v62, %v1583_v27  ;;  %v1589_v0 = vshll.u32 %v3381_v55, %v1574_v1 }
 0x15d   :  { %v3382_v13 = vmov 1326507024   ;;  %v2873_v47 = vadd.f32 1.0, %v1080_v3  ;;  %v3383_v56 = vsub.s32 4, %v2625_v38  ;;  %v2885_v26 = vsel %vm2836_vm5, %v2402_v8, %v1218_v63 }
 0x15e   :  { %v1590_v4 = vshrl.u32 %v3382_v13, %v1575_v50  ;;  %v2887_v40 = vshll.u32 %v1568_v34, 8  ;;  %v3384_v1 = vand.u32 2147483647, %v2502_v30  ;;  %v1504_v3 = vadd.s32 536870912, %v1503_v19 }
 0x15f   :  { %v2880_v46 = vsel %vm1097_vm14, %v3383_v56, %v2625_v38  ;;  %vm1592_vm10 = vcmp.lt.s32.totalorder %v2867_v58, 1  ;;  %vm1595_vm7 = vcmp.lt.s32.totalorder %v2867_v58, 4  ;;  %v2897_v38 = vpop.f32.mrf.mxu3  ;;  %v1372_v61 = vxor.u32 2147483648, %v1371_v57 }
 0x160   :  { %vm2891_vm9 = vcmp.le.f32.partialorder %v3384_v1, 0.7853982  ;;  %v1591_v51 = vor.u32 %v1590_v4, %v1589_v0  ;;  %vm1594_vm11 = vcmp.lt.s32.totalorder %v2867_v58, 3  ;;  %v1600_v34 = vsel %vm1592_vm10, %v1579_v18, %v1582_v6 }
 0x161   :  { %v1601_v63 = vsel %vm1595_vm7, %v1588_v33, 920167782  ;;  %v2904_v11 = vshrl.u32 %v1504_v3, 30  ;;  %vm1593_vm14 = vcmp.lt.s32.totalorder %v2867_v58, 2  ;;  %v1604_v21 = vsel %vm1592_vm10, %v1582_v6, %v1585_v7 }
 0x162   :  { %v1602_v24 = vsel %vm1594_vm11, %v1585_v7, %v1601_v63  ;;  %v1605_v49 = vsel %vm1595_vm7, %v1591_v51, 1326507024  ;;  %v1718_v15 = vand.u32 2139095040, %v2897_v38  ;;  %v2919_v20 = vmul.f32 %v2885_v26, %v2885_v26 }
 0x163   :  { %v1603_v35 = vsel %vm1593_vm14, %v1600_v34, %v1602_v24  ;;  %v1506_v29 = vshll.u32 %v2904_v11, 30  ;;  %v1606_v27 = vsel %vm1594_vm11, %v1588_v33, %v1605_v49  ;;  %v1609_v45 = vand.u32 65535, %v2887_v40 }
 0x164   :  { %v1576_v0 = vshrl.u32 %v3377_v59, %v1575_v50  ;;  %v1607_v4 = vsel %vm1593_vm14, %v1604_v21, %v1606_v27  ;;  %v1610_v56 = vshrl.u32 %v2887_v40, 16  ;;  %v1634_v1 = vshrl.u32 %v1603_v35, 16 }
 0x165   :  { %v1373_v3 = vsel %vm1252_vm8, %v1372_v61, %v1371_v57  ;;  %v1507_v51 = vsub.s32 %v1503_v19, %v1506_v29  ;;  %v1611_v34 = vand.u32 65535, %v1607_v4  ;;  %v1633_v63 = vand.u32 65535, %v1603_v35 }
 0x166   :  { %v1597_v24 = vsel %vm1595_vm7, %v1585_v7, 2102212464  ;;  %v1612_v33 = vshrl.u32 %v1607_v4, 16  ;;  %v1636_v49 = vmul.u32 %v1634_v1, %v1609_v45  ;;  %v1719_v62 = vshrl.u32 %v1718_v15, 23 }
 0x167   :  { %v1231_v50 = vmul.f32 -0.00019511016, %v2919_v20  ;;  %v1499_v21 = vadd.s32 %v2853_v28, %v2846_v5  ;;  %vm1508_vm15 = vcmp.lt.s32.totalorder %v1507_v51, 0  ;;  %v1509_v27 = vsub.s32 0, %v1507_v51 }
 0x168   :  { %v2939_v57 = vsel %vm2891_vm9, %v2502_v30, %v1373_v3  ;;  %v1596_v19 = vsel %vm1592_vm10, %v1576_v0, %v1579_v18  ;;  %v1614_v61 = vmul.u32 %v1612_v33, %v1609_v45  ;;  %v1615_v7 = vmul.u32 %v1611_v34, %v1610_v56 }
 0x169   :  { %v1510_v35 = vsel %vm1508_vm15, %v1509_v27, %v1507_v51  ;;  %v1598_v15 = vsel %vm1594_vm11, %v1582_v6, %v1597_v24  ;;  %v1637_v29 = vmul.u32 %v1633_v63, %v1610_v56  ;;  %v1639_v4 = vshll.u32 %v1636_v49, 16 }
 0x16a   :  { %v1511_v23 = vclz %v1510_v35  ;;  %v1613_v5 = vmul.u32 %v1611_v34, %v1609_v45  ;;  %v1617_v28 = vshll.u32 %v1614_v61, 16  ;;  %v1942_v8 = vadd.s32 4294967169, %v1719_v62 }
 0x16b   :  { %v1616_v17 = vmul.u32 %v1612_v33, %v1610_v56  ;;  %v1618_v37 = vshrl.u32 %v1614_v61, 16  ;;  %v1635_v22 = vmul.u32 %v1633_v63, %v1609_v45  ;;  %v1638_v3 = vmul.u32 %v1634_v1, %v1610_v56 }
 0x16c   :  { %v1937_v43 = vadd.s32 4294967294, %v1511_v23  ;;  %v1619_v42 = vshll.u32 %v1615_v7, 16  ;;  %vm1621_vm0 = vc.u32 %v1613_v5, %v1617_v28  ;;  %v1623_v18 = vadd.s32 %v1617_v28, %v1613_v5 }
 0x16d   :  { %v3387_v0 = vmov 0   ;;  %v1641_v27 = vshll.u32 %v1637_v29, 16  ;;  %vm1643_vm1 = vc.u32 %v1635_v22, %v1639_v4  ;;  %v1645_v60 = vadd.s32 %v1639_v4, %v1635_v22 }
 0x16e   :  { %v1622_v25 = vsel %vm1621_vm0, 1, %v3387_v0  ;;  %vm1938_vm2 = vcmp.lt.s32.totalorder %v1937_v43, 0  ;;  %vm1625_vm3 = vc.u32 %v1623_v18, %v1619_v42  ;;  %v1644_v34 = vsel %vm1643_vm1, 1, %v3387_v0 }
 0x16f   :  { %v1624_v6 = vadd.s32 %v1622_v25, %v1616_v17  ;;  %v1514_v24 = vsel %vm1938_vm2, 0, %v1937_v43  ;;  %v1626_v62 = vsel %vm1625_vm3, 1, %v3387_v0  ;;  %v1646_v33 = vadd.s32 %v1644_v34, %v1638_v3 }
 0x170   :  { %vm1647_vm6 = vc.u32 %v1645_v60, %v1641_v27  ;;  %v1515_v45 = vsub.s32 32, %v1514_v24  ;;  %v1519_v23 = vsub.s32 4294967266, %v1514_v24  ;;  %v1620_v56 = vshrl.u32 %v1615_v7, 16 }
 0x171   :  { %v1628_v1 = vadd.s32 %v1626_v62, %v1624_v6  ;;  %v1516_v63 = vshll.u32 %v1507_v51, %v1514_v24  ;;  %v1640_v61 = vshrl.u32 %v1636_v49, 16  ;;  %v1648_v35 = vsel %vm1647_vm6, 1, %v3387_v0 }
 0x172   :  { %v1725_v5 = vadd.s32 1, %v1942_v8  ;;  %v1517_v22 = vshrl.u32 %v1499_v21, %v1515_v45  ;;  %v1520_v4 = vadd.s32 127, %v1519_v23  ;;  %v1650_v42 = vadd.s32 %v1648_v35, %v1646_v33 }
 0x173   :  { %v1629_v17 = vadd.s32 %v1628_v1, %v1618_v37  ;;  %v1232_v25 = vadd.f32 0.008332121, %v1231_v50  ;;  %v2951_v43 = vmul.f32 %v2939_v57, %v2939_v57  ;;  %v1642_v28 = vshrl.u32 %v1637_v29, 16 }
 0x174   :  { %vm1726_vm10 = vcmp.gt.s32.totalorder %v1725_v5, 0  ;;  %v1518_v3 = vor.u32 %v1517_v22, %v1516_v63  ;;  %v1521_v18 = vshll.u32 %v1520_v4, 23  ;;  %v1651_v51 = vadd.s32 %v1650_v42, %v1640_v61 }
 0x175   :  { %v2953_v7 = vadd.s32 %v1629_v17, %v1620_v56  ;;  %vm1407_vm7 = vcmp.lt.s32.totalorder %v2661_v53, 0  ;;  %v1599_v8 = vsel %vm1593_vm14, %v1596_v19, %v1598_v15  ;;  %v2958_v49 = vadd.s32 %v1645_v60, %v1641_v27 }
 0x176   :  { %v3388_v37 = vand.u32 2147483647, %v2897_v38  ;;  %v1727_v21 = vsel %vm1726_vm10, %v1725_v5, 0  ;;  %v2964_v29 = vmul.f32 %v2873_v47, %v2698_v12  ;;  %v3389_v34 = vand.u32 2147483647, %v2661_v53 }
 0x177   :  { %v1522_v60 = vor.u32 4788187, %v1521_v18  ;;  %v1652_v58 = vadd.s32 %v1651_v51, %v1642_v28  ;;  %v1233_v19 = vmul.f32 %v1232_v25, %v2919_v20  ;;  %v1386_v15 = vmul.f32 -0.00019511016, %v2951_v43 }
 0x178   :  { %v1722_v50 = vand.u32 8388607, %v3388_v37  ;;  %vm2971_vm11 = vcmp.le.f32.partialorder %v3389_v34, 0.7853982  ;;  %vm1655_vm14 = vc.u32 %v2953_v7, %v2958_v49  ;;  %v1729_v12 = vand.u32 31, %v1727_v21 }
 0x179   :  { %v1523_v47 = vand.u32 2147483647, %v1522_v60  ;;  %v1525_v27 = vcvt.s32.f32 %v1518_v3  ;;  %v1653_v62 = vmul.u32 %v2887_v40, %v1599_v8  ;;  %v1656_v33 = vadd.s32 1, %v1652_v58 }
 0x17a   :  { %v1723_v45 = vor.u32 8388608, %v1722_v50  ;;  %v2980_v23 = vshrl.u32 %v1727_v21, 5  ;;  %v2982_v56 = vsub.s32 32, %v1729_v12  ;;  %v1732_v1 = vshll.u32 %v3377_v59, %v1729_v12 }
 0x17b   :  { %v1526_v63 = vmul.f32 %v1525_v27, %v1523_v47  ;;  %v1657_v61 = vsel %vm1655_vm14, %v1656_v33, %v1652_v58  ;;  %v1735_v35 = vshll.u32 %v3378_v14, %v1729_v12  ;;  %v1738_v5 = vshll.u32 %v3379_v44, %v1729_v12 }
 0x17c   :  { %v1658_v22 = vadd.s32 %v1657_v61, %v1653_v62  ;;  %v1733_v4 = vshrl.u32 %v3378_v14, %v2982_v56  ;;  %v1736_v40 = vshrl.u32 %v3379_v44, %v2982_v56  ;;  %v1741_v17 = vshll.u32 %v3380_v9, %v1729_v12 }
 0x17d   :  { %v1527_v42 = vxor.u32 2147483648, %v1526_v63  ;;  %v1739_v25 = vshrl.u32 %v3380_v9, %v2982_v56  ;;  %v1742_v28 = vshrl.u32 %v3381_v55, %v2982_v56  ;;  %v1745_v3 = vshrl.u32 %v3382_v13, %v2982_v56 }
 0x17e   :  { %v1234_v18 = vadd.f32 -0.16666654, %v1233_v19  ;;  %v1659_v51 = vadd.s32 536870912, %v1658_v22  ;;  %v2998_v8 = vor.u32 %v1733_v4, %v1732_v1  ;;  %v3000_v14 = vor.u32 %v1736_v40, %v1735_v35 }
 0x17f   :  { %v1528_v44 = vsel %vm1407_vm7, %v1527_v42, %v1526_v63  ;;  %v3004_v37 = vor.u32 %v1739_v25, %v1738_v5  ;;  %v1743_v50 = vor.u32 %v1742_v28, %v1741_v17  ;;  %v1744_v9 = vshll.u32 %v3381_v55, %v1729_v12 }
 0x180   :  { %v1387_v21 = vadd.f32 0.008332121, %v1386_v15  ;;  %v3010_v34 = vsel %vm2971_vm11, %v2661_v53, %v1528_v44  ;;  %v3012_v13 = vshrl.u32 %v1659_v51, 30  ;;  %vm1747_vm15 = vcmp.lt.s32.totalorder %v2980_v23, 1 }
 0x181   :  { %v1746_v60 = vor.u32 %v1745_v3, %v1744_v9  ;;  %vm1750_vm0 = vcmp.lt.s32.totalorder %v2980_v23, 4  ;;  %v1755_v58 = vsel %vm1747_vm15, %v2998_v8, %v3000_v14  ;;  %v3020_v19 = vshll.u32 %v1723_v45, 8 }
 0x182   :  { %v1374_v55 = vsub.s32 4, %v2758_v31  ;;  %v1661_v15 = vshll.u32 %v3012_v13, 30  ;;  %vm1749_vm1 = vcmp.lt.s32.totalorder %v2980_v23, 3  ;;  %v1756_v12 = vsel %vm1750_vm0, %v1743_v50, 920167782 }
 0x183   :  { %v1235_v47 = vmul.f32 %v1234_v18, %v2919_v20  ;;  %v3030_v27 = vmul.f32 %v3010_v34, %v3010_v34  ;;  %vm1748_vm2 = vcmp.lt.s32.totalorder %v2980_v23, 2  ;;  %v1757_v62 = vsel %vm1749_vm1, %v3004_v37, %v1756_v12 }
 0x184   :  { %v1388_v33 = vmul.f32 %v1387_v21, %v2951_v43  ;;  %v1662_v45 = vsub.s32 %v1658_v22, %v1661_v15  ;;  %v1758_v1 = vsel %vm1748_vm2, %v1755_v58, %v1757_v62  ;;  %v1759_v63 = vsel %vm1747_vm15, %v3000_v14, %v3004_v37 }
 0x185   :  { %v1529_v61 = vsub.s32 4, %v2904_v11  ;;  %v1760_v35 = vsel %vm1750_vm0, %v1746_v60, 1326507024  ;;  %v1764_v5 = vand.u32 65535, %v3020_v19  ;;  %v1788_v4 = vand.u32 65535, %v1758_v1 }
 0x186   :  { %vm1663_vm3 = vcmp.lt.s32.totalorder %v1662_v45, 0  ;;  %v1664_v40 = vsub.s32 0, %v1662_v45  ;;  %v1761_v22 = vsel %vm1749_vm1, %v1743_v50, %v1760_v35  ;;  %v1789_v17 = vshrl.u32 %v1758_v1, 16 }
 0x187   :  { %v3052_v42 = vsel %vm1252_vm8, %v1374_v55, %v2758_v31  ;;  %v1541_v25 = vmul.f32 -0.00019511016, %v3030_v27  ;;  %v1762_v28 = vsel %vm1748_vm2, %v1759_v63, %v1761_v22  ;;  %v1765_v3 = vshrl.u32 %v3020_v19, 16 }
 0x188   :  { %v1665_v18 = vsel %vm1663_vm3, %v1664_v40, %v1662_v45  ;;  %v1766_v51 = vand.u32 65535, %v1762_v28  ;;  %v1767_v44 = vshrl.u32 %v1762_v28, 16  ;;  %v1791_v9 = vmul.u32 %v1789_v17, %v1764_v5 }
 0x189   :  { %v1236_v21 = vadd.f32 1.0, %v1235_v47  ;;  %v1389_v60 = vadd.f32 -0.16666654, %v1388_v33  ;;  %v1666_v50 = vclz %v1665_v18  ;;  %v3058_v58 = vmul.u32 %v1788_v4, %v1765_v3 }
 0x18a   :  { %v3063_v31 = vsel %vm1407_vm7, %v1529_v61, %v2904_v11  ;;  %v1654_v55 = vadd.s32 %v2958_v49, %v2953_v7  ;;  %v1769_v15 = vmul.u32 %v1767_v44, %v1764_v5  ;;  %v1770_v12 = vmul.u32 %v1766_v51, %v1765_v3 }
 0x18b   :  { %v1940_v62 = vadd.s32 4294967294, %v1666_v50  ;;  %v1731_v1 = vshrl.u32 %v3377_v59, %v2982_v56  ;;  %v1790_v63 = vmul.u32 %v1788_v4, %v1764_v5  ;;  %v1794_v47 = vshll.u32 %v1791_v9, 16 }
 0x18c   :  { %v1542_v33 = vadd.f32 0.008332121, %v1541_v25  ;;  %v1768_v35 = vmul.u32 %v1766_v51, %v1764_v5  ;;  %v1772_v40 = vshll.u32 %v1769_v15, 16  ;;  %v1793_v22 = vmul.u32 %v1789_v17, %v1765_v3 }
 0x18d   :  { %vm1941_vm8 = vcmp.lt.s32.totalorder %v1940_v62, 0  ;;  %v1774_v28 = vshll.u32 %v1770_v12, 16  ;;  %v1796_v11 = vshll.u32 %v3058_v58, 16  ;;  %vm1798_vm6 = vc.u32 %v1790_v63, %v1794_v47 }
 0x18e   :  { %v1669_v61 = vsel %vm1941_vm8, 0, %v1940_v62  ;;  %vm1776_vm10 = vc.u32 %v1768_v35, %v1772_v40  ;;  %v1778_v7 = vadd.s32 %v1772_v40, %v1768_v35  ;;  %v1799_v49 = vsel %vm1798_vm6, 1, %v3387_v0 }
 0x18f   :  { %v1670_v18 = vsub.s32 32, %v1669_v61  ;;  %v1671_v50 = vshll.u32 %v1662_v45, %v1669_v61  ;;  %v1674_v6 = vsub.s32 4294967266, %v1669_v61  ;;  %v1771_v59 = vmul.u32 %v1767_v44, %v1765_v3 }
 0x190   :  { %v1777_v56 = vsel %vm1776_vm10, 1, %v3387_v0  ;;  %vm1780_vm7 = vc.u32 %v1778_v7, %v1774_v28  ;;  %v1800_v5 = vadd.s32 %v1794_v47, %v1790_v63  ;;  %v1801_v4 = vadd.s32 %v1799_v49, %v1793_v22 }
 0x191   :  { %vm1562_vm14 = vcmp.lt.s32.totalorder %v2766_v52, 0  ;;  %v1672_v17 = vshrl.u32 %v1654_v55, %v1670_v18  ;;  %v1675_v25 = vadd.s32 127, %v1674_v6  ;;  %v1779_v51 = vadd.s32 %v1777_v56, %v1771_v59 }
 0x192   :  { %v1781_v62 = vsel %vm1780_vm7, 1, %v3387_v0  ;;  %v1543_v35 = vmul.f32 %v1542_v33, %v3030_v27  ;;  %v1752_v45 = vsel %vm1750_vm0, %v3004_v37, 2102212464  ;;  %v1773_v40 = vshrl.u32 %v1769_v15, 16 }
 0x193   :  { %vm1802_vm3 = vc.u32 %v1800_v5, %v1796_v11  ;;  %v1673_v3 = vor.u32 %v1672_v17, %v1671_v50  ;;  %v1676_v44 = vshll.u32 %v1675_v25, 23  ;;  %v1783_v28 = vadd.s32 %v1781_v62, %v1779_v51 }
 0x194   :  { %v1803_v63 = vsel %vm1802_vm3, 1, %v3387_v0  ;;  %v1390_v47 = vmul.f32 %v1389_v60, %v2951_v43  ;;  %v1751_v6 = vsel %vm1747_vm15, %v1731_v1, %v2998_v8  ;;  %v1795_v55 = vshrl.u32 %v1791_v9, 16 }
 0x195   :  { %v1805_v22 = vadd.s32 %v1803_v63, %v1801_v4  ;;  %v3392_v33 = vand.u32 2147483647, %v2766_v52  ;;  %v1677_v37 = vor.u32 4788187, %v1676_v44  ;;  %v1753_v15 = vsel %vm1749_vm1, %v3000_v14, %v1752_v45 }
 0x196   :  { %v1775_v0 = vshrl.u32 %v1770_v12, 16  ;;  %v1784_v7 = vadd.s32 %v1783_v28, %v1773_v40  ;;  %v1544_v60 = vadd.f32 -0.16666654, %v1543_v35  ;;  %v1684_v49 = vsub.s32 4, %v3012_v13  ;;  %v3397_v35 = vld [vmem:[#allocation22_spill] sm:$0xff] }
 0x197   :  { %vm3085_vm8 = vcmp.le.f32.partialorder %v3392_v33, 0.7853982  ;;  %v1797_v8 = vshrl.u32 %v3058_v58, 16  ;;  %v1806_v9 = vadd.s32 %v1805_v22, %v1795_v55  ;;  %v1678_v1 = vand.u32 2147483647, %v1677_v37 }
 0x198   :  { %v1680_v18 = vcvt.s32.f32 %v1673_v3  ;;  %v1785_v50 = vadd.s32 %v1784_v7, %v1775_v0  ;;  %v1804_v59 = vadd.s32 %v1800_v5, %v1796_v11  ;;  %v3095_v56 = vmul.f32 %v1236_v21, %v2885_v26 }
 0x199   :  { %v1377_v4 = vsel %vm2891_vm9, 0, %v3052_v42  ;;  %v1754_v14 = vsel %vm1748_vm2, %v1751_v6, %v1753_v15  ;;  %v1807_v12 = vadd.s32 %v1806_v9, %v1797_v8  ;;  %v1391_v17 = vadd.f32 1.0, %v1390_v47  ;;  %v3400_v8 = vld [vmem:[#allocation20_spill] sm:$0xff] }
 0x19a   :  { %v1532_v58 = vsel %vm2971_vm11, 0, %v3063_v31  ;;  %v1681_v25 = vmul.f32 %v1680_v18, %v1678_v1  ;;  %vm1810_vm15 = vc.u32 %v1785_v50, %v1804_v59  ;;  %v1545_v11 = vmul.f32 %v1544_v60, %v3030_v27 }
 0x19b   :  { %v3109_v26 = vsel %vm1562_vm14, %v1684_v49, %v3012_v13  ;;  %v1811_v2 = vadd.s32 1, %v1807_v12  ;;  %v3395_v23 = vsel %vm2447_vm4, 0, %v2499_v16  ;;  %v1808_v5 = vmul.u32 %v3020_v19, %v1754_v14 }
 0x19c   :  { %v774_v42 = vadd.s32 3, %v3395_v23  ;;  %v1682_v21 = vxor.u32 2147483648, %v1681_v25  ;;  %v759_v24 = vmul.f32 -0.001358992, %v2467_v54  ;;  %v914_v31 = vmul.f32 -0.001358992, %v2581_v39 }
 0x19d   :  { %v1812_v51 = vsel %vm1810_vm15, %v1811_v2, %v1807_v12  ;;  %v3396_v62 = vsel %vm2540_vm13, 0, %v2646_v41  ;;  %v3398_v32 = vsel %vm2676_vm12, 0, %v3397_v35  ;;  %v3399_v16 = vsel %vm2836_vm5, 0, %v2880_v46  ;;  %v3403_v35 = vld [vmem:[#allocation21_spill] sm:$0xff] }
 0x19e   :  { %v929_v13 = vadd.s32 3, %v3396_v62  ;;  %v1084_v45 = vadd.s32 3, %v3398_v32  ;;  %v1239_v19 = vadd.s32 3, %v3399_v16  ;;  %v1683_v40 = vsel %vm1562_vm14, %v1682_v21, %v1681_v25 }
 0x19f   :  { %v1813_v3 = vadd.s32 %v1812_v51, %v1808_v5  ;;  %v760_v44 = vadd.f32 0.041655596, %v759_v24  ;;  %v915_v28 = vadd.f32 0.041655596, %v914_v31  ;;  %v3133_v10 = vmul.f32 %v1391_v17, %v2939_v57  ;;  %v3401_v17 = vld [vmem:[#allocation16_spill] sm:$0xff]  ;;  %v3402_v5 = vld [vmem:[#allocation17_spill] sm:$0xff] }
 0x1a0   :  { %v1546_v41 = vadd.f32 1.0, %v1545_v11  ;;  %v3138_v36 = vsel %vm3085_vm8, %v2766_v52, %v1683_v40  ;;  %v3140_v63 = vand.u32 3, %v774_v42  ;;  %v1687_v57 = vsel %vm3085_vm8, 0, %v3109_v26 }
 0x1a1   :  { %v3144_v48 = vmul.f32 %v3138_v36, %v3138_v36  ;;  %v1814_v46 = vadd.s32 536870912, %v1813_v3  ;;  %v761_v47 = vmul.f32 %v760_v44, %v2467_v54  ;;  %v916_v6 = vmul.f32 %v915_v28, %v2581_v39  ;;  %v3405_v28 = vld [vmem:[#allocation18_spill] sm:$0xff] }
 0x1a2   :  { %v3151_v55 = vand.u32 3, %v929_v13  ;;  %v3153_v22 = vand.u32 3, %v1084_v45  ;;  %v3155_v33 = vand.u32 3, %v1239_v19  ;;  %v1394_v7 = vadd.s32 3, %v1377_v4  ;;  %v3192_v13 = vld [vmem:[#allocation10] sm:$0xff] }
 0x1a3   :  { %v1696_v37 = vmul.f32 -0.00019511016, %v3144_v48  ;;  %v3158_v15 = vshrl.u32 %v1814_v46, 30  ;;  %v762_v0 = vadd.f32 -0.4999988, %v761_v47  ;;  %v3161_v60 = vmul.f32 %v1546_v41, %v3010_v34  ;;  %v487_v41 = vpop.f32.mrf.mxu0 }
 0x1a4   :  { %vm777_vm4 = vcmp.eq.s32.totalorder %v3140_v63, 0  ;;  %vm780_vm13 = vcmp.eq.s32.totalorder %v3140_v63, 2  ;;  %v917_v49 = vadd.f32 -0.4999988, %v916_v6  ;;  %v1069_v9 = vmul.f32 -0.001358992, %v3400_v8  ;;  %v507_v6 = vpop.f32.mrf.mxu1 }
 0x1a5   :  { %v1224_v1 = vmul.f32 -0.001358992, %v2919_v20  ;;  %v1697_v18 = vadd.f32 0.008332121, %v1696_v37  ;;  %v1816_v14 = vshll.u32 %v3158_v15, 30  ;;  %v763_v12 = vmul.f32 %v762_v0, %v2467_v54 }
 0x1a6   :  { %vm776_vm12 = vcmp.lt.s32.totalorder %v3140_v63, 2  ;;  %v3170_v4 = vadd.s32 3, %v1532_v58  ;;  %v3172_v34 = vadd.s32 %v1804_v59, %v1785_v50  ;;  %vm773_vm5 = vweird.f32 %v3401_v17 }
 0x1a7   :  { %v918_v25 = vmul.f32 %v917_v49, %v2581_v39  ;;  %v1070_v11 = vadd.f32 0.041655596, %v1069_v9  ;;  %v1225_v2 = vadd.f32 0.041655596, %v1224_v1  ;;  %v1698_v23 = vmul.f32 %v1697_v18, %v3144_v48 }
 0x1a8   :  { %v3177_v42 = vsub.s32 %v1813_v3, %v1816_v14  ;;  %v764_v21 = vadd.f32 1.0, %v763_v12  ;;  %vm931_vm9 = vcmp.lt.s32.totalorder %v3151_v55, 2  ;;  %vm928_vm11 = vweird.f32 %v3402_v5  ;;  %v3404_v3 = vld [vmem:[#allocation23_spill] sm:$0xff] }
 0x1a9   :  { %v919_v54 = vadd.f32 1.0, %v918_v25  ;;  %vm932_vm0 = vcmp.eq.s32.totalorder %v3151_v55, 0  ;;  %vm935_vm1 = vcmp.eq.s32.totalorder %v3151_v55, 2  ;;  %v1071_v50 = vmul.f32 %v1070_v11, %v3400_v8 }
 0x1aa   :  { %vm1818_vm2 = vcmp.lt.s32.totalorder %v3177_v42, 0  ;;  %v1819_v39 = vsub.s32 0, %v3177_v42  ;;  %v781_v59 = vxor.u32 2147483648, %v764_v21  ;;  %v1226_v58 = vmul.f32 %v1225_v2, %v2919_v20  ;;  %v527_v2 = vpop.f32.mrf.mxu2 }
 0x1ab   :  { %v1072_v24 = vadd.f32 -0.4999988, %v1071_v50  ;;  %vm1087_vm6 = vcmp.eq.s32.totalorder %v3153_v22, 0  ;;  %vm1090_vm10 = vcmp.eq.s32.totalorder %v3153_v22, 2  ;;  %v3189_v31 = vand.u32 3, %v1394_v7 }
 0x1ac   :  { %v1699_v51 = vadd.f32 -0.16666654, %v1698_v23  ;;  %v1820_v62 = vsel %vm1818_vm2, %v1819_v39, %v3177_v42  ;;  %v778_v32 = vxor.u32 2147483648, %v3403_v35  ;;  %v936_v45 = vxor.u32 2147483648, %v919_v54 }
 0x1ad   :  { %vm1086_vm7 = vcmp.lt.s32.totalorder %v3153_v22, 2  ;;  %v1821_v16 = vclz %v1820_v62  ;;  %v454_v19 = vperm.slane %v3192_v13, 0  ;;  %v455_v40 = vperm.slane %v3192_v13, 1 }
 0x1ae   :  { %v933_v44 = vxor.u32 2147483648, %v3404_v3  ;;  %vm1083_vm14 = vweird.f32 %v3405_v28  ;;  %v779_v46 = vsel %vm777_vm4, %v764_v21, %v778_v32  ;;  %v782_v47 = vsel %vm780_vm13, %v781_v59, %v3403_v35  ;;  %v3406_v35 = vld [vmem:[#allocation19_spill] sm:$0xff] }
 0x1af   :  { %v1073_v37 = vmul.f32 %v1072_v24, %v3400_v8  ;;  %v1227_v0 = vadd.f32 -0.4999988, %v1226_v58  ;;  %v1943_v7 = vadd.s32 4294967294, %v1821_v16  ;;  %v488_v49 = vadd.f32 %v487_v41, %v454_v19 }
 0x1b0   :  { %v783_v9 = vsel %vm776_vm12, %v779_v46, %v782_v47  ;;  %v508_v1 = vadd.f32 %v507_v6, %v455_v40  ;;  %vm1717_vm3 = vcmp.lt.s32.totalorder %v2897_v38, 0  ;;  %v934_v14 = vsel %vm932_vm0, %v919_v54, %v933_v44 }
 0x1b1   :  { %v784_v18 = vsel %vm773_vm5, nan, %v783_v9  ;;  %v937_v12 = vsel %vm935_vm1, %v936_v45, %v3404_v3  ;;  %v1074_v8 = vadd.f32 1.0, %v1073_v37  ;;  %vm1944_vm15 = vcmp.lt.s32.totalorder %v1943_v7, 0 }
 0x1b2   :  { %v1870_v25 = vadd.f32 %v784_v18, %v488_v49  ;;  %v938_v63 = vsel %vm931_vm9, %v934_v14, %v937_v12  ;;  %v456_v11 = vperm.slane %v3192_v13, 2  ;;  %v1824_v23 = vsel %vm1944_vm15, 0, %v1943_v7 }
 0x1b3   :  { %v939_v17 = vsel %vm928_vm11, nan, %v938_v63  ;;  %v1088_v21 = vxor.u32 2147483648, %v2964_v29  ;;  %v1091_v54 = vxor.u32 2147483648, %v1074_v8  ;;  %v1825_v50 = vsub.s32 32, %v1824_v23 }
 0x1b4   :  { %v1829_v39 = vsub.s32 4294967266, %v1824_v23  ;;  %v1839_v59 = vsub.s32 4, %v3158_v15  ;;  %1878 = vst [vmem:[#allocation11] sm:$0xff] %v1870_v25  ;;  %v1871_v58 = vadd.f32 %v939_v17, %v508_v1  ;;  %vm1241_vm4 = vcmp.lt.s32.totalorder %v3155_v33, 2 }
 0x1b5   :  { %v1826_v55 = vshll.u32 %v3177_v42, %v1824_v23  ;;  %v528_v24 = vadd.f32 %v527_v2, %v456_v11  ;;  %v1089_v62 = vsel %vm1087_vm6, %v1074_v8, %v1088_v21  ;;  %v1092_v5 = vsel %vm1090_vm10, %v1091_v54, %v2964_v29  ;;  %v567_v54 = vpop.f32.mrf.mxu0 }
 0x1b6   :  { %vm1238_vm13 = vweird.f32 %v3406_v35  ;;  %v3407_v32 = vand.u32 2147483647, %v2897_v38  ;;  %v1827_v16 = vshrl.u32 %v3172_v34, %v1825_v50  ;;  %v1830_v19 = vadd.s32 127, %v1829_v39  ;;  %1879 = vst [vmem:[#allocation11 + $0x8] sm:$0xff] %v1871_v58  ;;  %v547_v34 = vpop.f32.mrf.mxu3 }
 0x1b7   :  { %v1093_v42 = vsel %vm1086_vm7, %v1089_v62, %v1092_v5  ;;  %v1228_v40 = vmul.f32 %v1227_v0, %v2919_v20  ;;  %v1700_v3 = vmul.f32 %v1699_v51, %v3144_v48  ;;  %v457_v44 = vperm.slane %v3192_v13, 3 }
 0x1b8   :  { %vm3233_vm12 = vcmp.le.f32.partialorder %v3407_v32, 0.7853982  ;;  %v1094_v29 = vsel %vm1083_vm14, nan, %v1093_v42  ;;  %v1243_v41 = vxor.u32 2147483648, %v3095_v56  ;;  %v1828_v46 = vor.u32 %v1827_v16, %v1826_v55  ;;  %v607_v32 = vpop.f32.mrf.mxu2 }
 0x1b9   :  { %v1831_v47 = vshll.u32 %v1830_v19, 23  ;;  %v1872_v6 = vadd.f32 %v1094_v29, %v528_v24  ;;  %v1229_v37 = vadd.f32 1.0, %v1228_v40  ;;  %vm1242_vm5 = vcmp.eq.s32.totalorder %v3155_v33, 0  ;;  %v587_v24 = vpop.f32.mrf.mxu1 }
 0x1ba   :  { %vm1245_vm9 = vcmp.eq.s32.totalorder %v3155_v33, 2  ;;  %v1379_v20 = vmul.f32 -0.001358992, %v2951_v43  ;;  %v3250_v22 = vand.u32 3, %v3170_v4  ;;  %v3255_v28 = vsel %vm1717_vm3, %v1839_v59, %v3158_v15 }
 0x1bb   :  { %v1832_v51 = vor.u32 4788187, %v1831_v47  ;;  %1880 = vst [vmem:[#allocation11 + $0x10] sm:$0xff] %v1872_v6  ;;  %v1244_v0 = vsel %vm1242_vm5, %v1229_v37, %v1243_v41  ;;  %v1246_v7 = vxor.u32 2147483648, %v1229_v37  ;;  %v1701_v49 = vadd.f32 1.0, %v1700_v3 }
 0x1bc   :  { %v548_v9 = vadd.f32 %v547_v34, %v457_v44  ;;  %v1380_v1 = vadd.f32 0.041655596, %v1379_v20  ;;  %v1534_v18 = vmul.f32 -0.001358992, %v3030_v27  ;;  %v1835_v12 = vcvt.s32.f32 %v1828_v46 }
 0x1bd   :  { %v1833_v14 = vand.u32 2147483647, %v1832_v51  ;;  %v1247_v8 = vsel %vm1245_vm9, %v1246_v7, %v3095_v56  ;;  %vm1397_vm11 = vcmp.eq.s32.totalorder %v3189_v31, 0  ;;  %v1689_v4 = vmul.f32 -0.001358992, %v3144_v48 }
 0x1be   :  { %v1248_v15 = vsel %vm1241_vm4, %v1244_v0, %v1247_v8  ;;  %v458_v25 = vperm.slane %v3192_v13, 4  ;;  %v1381_v63 = vmul.f32 %v1380_v1, %v2951_v43  ;;  %v1535_v11 = vadd.f32 0.041655596, %v1534_v18 }
 0x1bf   :  { %v1836_v2 = vmul.f32 %v1835_v12, %v1833_v14  ;;  %v1249_v23 = vsel %vm1238_vm13, nan, %v1248_v15  ;;  %vm1400_vm0 = vcmp.eq.s32.totalorder %v3189_v31, 2  ;;  %vm1552_vm1 = vcmp.eq.s32.totalorder %v3250_v22, 0 }
 0x1c0   :  { %v1690_v56 = vadd.f32 0.041655596, %v1689_v4  ;;  %v1704_v33 = vadd.s32 3, %v1687_v57  ;;  %v1842_v17 = vsel %vm3233_vm12, 0, %v3255_v28  ;;  %v1873_v21 = vadd.f32 %v1249_v23, %v548_v9 }
 0x1c1   :  { %v1382_v50 = vadd.f32 -0.4999988, %v1381_v63  ;;  %vm1396_vm2 = vcmp.lt.s32.totalorder %v3189_v31, 2  ;;  %v1536_v39 = vmul.f32 %v1535_v11, %v3030_v27  ;;  %v1702_v59 = vmul.f32 %v1701_v49, %v3138_v36 }
 0x1c2   :  { %v1837_v58 = vxor.u32 2147483648, %v1836_v2  ;;  %vm1393_vm6 = vweird.f32 %v2502_v30  ;;  %v459_v61 = vperm.slane %v3192_v13, 5  ;;  %vm1555_vm8 = vcmp.eq.s32.totalorder %v3250_v22, 2  ;;  %1881 = vst [vmem:[#allocation11 + $0x18] sm:$0xff] %v1873_v21 }
 0x1c3   :  { %v1691_v26 = vmul.f32 %v1690_v56, %v3144_v48  ;;  %v1383_v57 = vmul.f32 %v1382_v50, %v2951_v43  ;;  %v1398_v55 = vxor.u32 2147483648, %v3133_v10  ;;  %v1537_v62 = vadd.f32 -0.4999988, %v1536_v39 }
 0x1c4   :  { %vm1551_vm10 = vcmp.lt.s32.totalorder %v3250_v22, 2  ;;  %v460_v36 = vperm.slane %v3192_v13, 6  ;;  %v1838_v5 = vsel %vm1717_vm3, %v1837_v58, %v1836_v2  ;;  %v568_v35 = vadd.f32 %v567_v54, %v458_v25 }
 0x1c5   :  { %vm1548_vm7 = vweird.f32 %v2661_v53  ;;  %v1692_v16 = vadd.f32 -0.4999988, %v1691_v26  ;;  %v1705_v19 = vand.u32 3, %v1704_v33  ;;  %v1841_v43 = vsel %vm3233_vm12, %v2897_v38, %v1838_v5 }
 0x1c6   :  { %v1384_v42 = vadd.f32 1.0, %v1383_v57  ;;  %v1538_v40 = vmul.f32 %v1537_v62, %v3030_v27  ;;  %v1553_v3 = vxor.u32 2147483648, %v3161_v60  ;;  %v1843_v29 = vmul.f32 %v1841_v43, %v1841_v43 }
 0x1c7   :  { %v588_v44 = vadd.f32 %v587_v24, %v459_v61  ;;  %v1693_v41 = vmul.f32 %v1692_v16, %v3144_v48  ;;  %v1708_v46 = vxor.u32 2147483648, %v1702_v59  ;;  %v608_v37 = vadd.f32 %v607_v32, %v460_v36 }
 0x1c8   :  { %v1399_v47 = vsel %vm1397_vm11, %v1384_v42, %v1398_v55  ;;  %v1401_v6 = vxor.u32 2147483648, %v1384_v42  ;;  %v1539_v34 = vadd.f32 1.0, %v1538_v40  ;;  %v1851_v20 = vmul.f32 -0.00019511016, %v1843_v29 }
 0x1c9   :  { %v1694_v51 = vadd.f32 1.0, %v1693_v41  ;;  %vm1706_vm14 = vcmp.lt.s32.totalorder %v1705_v19, 2  ;;  %v1844_v0 = vmul.f32 -0.001358992, %v1843_v29  ;;  %vm1707_vm3 = vcmp.eq.s32.totalorder %v1705_v19, 0 }
 0x1ca   :  { %v1402_v27 = vsel %vm1400_vm0, %v1401_v6, %v3133_v10  ;;  %v1554_v7 = vsel %vm1552_vm1, %v1539_v34, %v1553_v3  ;;  %v1556_v49 = vxor.u32 2147483648, %v1539_v34  ;;  %v1852_v48 = vadd.f32 0.008332121, %v1851_v20 }
 0x1cb   :  { %v1403_v9 = vsel %vm1396_vm2, %v1399_v47, %v1402_v27  ;;  %v1709_v1 = vsel %vm1707_vm3, %v1694_v51, %v1708_v46  ;;  %v1711_v18 = vxor.u32 2147483648, %v1694_v51  ;;  %vm1710_vm15 = vcmp.eq.s32.totalorder %v1705_v19, 2 }
 0x1cc   :  { %v1404_v14 = vsel %vm1393_vm6, nan, %v1403_v9  ;;  %v1557_v12 = vsel %vm1555_vm8, %v1556_v49, %v3161_v60  ;;  %v1845_v10 = vadd.f32 0.041655596, %v1844_v0  ;;  %v1853_v8 = vmul.f32 %v1852_v48, %v1843_v29 }
 0x1cd   :  { %v1874_v4 = vadd.f32 %v1404_v14, %v568_v35  ;;  %v1558_v15 = vsel %vm1551_vm10, %v1554_v7, %v1557_v12  ;;  %v1712_v25 = vsel %vm1710_vm15, %v1711_v18, %v1702_v59  ;;  %vm1703_vm4 = vweird.f32 %v2766_v52  ;;  %v627_v59 = vpop.f32.mrf.mxu3 }
 0x1ce   :  { %v1559_v31 = vsel %vm1548_vm7, nan, %v1558_v15  ;;  %v1713_v30 = vsel %vm1706_vm14, %v1709_v1, %v1712_v25  ;;  %v1846_v63 = vmul.f32 %v1845_v10, %v1843_v29  ;;  %v1854_v11 = vadd.f32 -0.16666654, %v1853_v8 }
 0x1cf   :  { %1882 = vst [vmem:[#allocation11 + $0x20] sm:$0xff] %v1874_v4  ;;  %v1875_v2 = vadd.f32 %v1559_v31, %v588_v44  ;;  %v1714_v60 = vsel %vm1703_vm4, nan, %v1713_v30  ;;  %v1859_v22 = vadd.s32 3, %v1842_v17  ;;  %v461_v52 = vperm.slane %v3192_v13, 7 }
 0x1d0   :  { %v1876_v23 = vadd.f32 %v1714_v60, %v608_v37  ;;  %v1847_v56 = vadd.f32 -0.4999988, %v1846_v63  ;;  %v1855_v33 = vmul.f32 %v1854_v11, %v1843_v29  ;;  %vm1858_vm12 = vweird.f32 %v2897_v38 }
 0x1d1   :  { %1883 = vst [vmem:[#allocation11 + $0x28] sm:$0xff] %v1875_v2  ;;  %v1860_v50 = vand.u32 3, %v1859_v22  ;;  %v628_v26 = vadd.f32 %v627_v59, %v461_v52 }
 0x1d2   :  { %1884 = vst [vmem:[#allocation11 + $0x30] sm:$0xff] %v1876_v23  ;;  %v1848_v53 = vmul.f32 %v1847_v56, %v1843_v29  ;;  %v1856_v21 = vadd.f32 1.0, %v1855_v33 }
 0x1d3   :  { %vm1862_vm13 = vcmp.eq.s32.totalorder %v1860_v50, 0  ;;  %vm1865_vm5 = vcmp.eq.s32.totalorder %v1860_v50, 2  ;;  %vm1861_vm9 = vcmp.lt.s32.totalorder %v1860_v50, 2 }
 0x1d4   :  { %v1849_v54 = vadd.f32 1.0, %v1848_v53  ;;  %v1857_v39 = vmul.f32 %v1856_v21, %v1841_v43 }
 0x1d6   :  { %v1866_v58 = vxor.u32 2147483648, %v1849_v54  ;;  %v1863_v61 = vxor.u32 2147483648, %v1857_v39 }
 0x1d8   :  { %v1864_v45 = vsel %vm1862_vm13, %v1849_v54, %v1863_v61  ;;  %v1867_v28 = vsel %vm1865_vm5, %v1866_v58, %v1857_v39 }
 0x1d9   :  { %v1868_v13 = vsel %vm1861_vm9, %v1864_v45, %v1867_v28 }
 0x1da   :  { %v1869_v17 = vsel %vm1858_vm12, nan, %v1868_v13 }
 0x1db   :  { %v1877_v57 = vadd.f32 %v1869_v17, %v628_v26 }
 0x1dd   :  { %1885 = vst [vmem:[#allocation11 + $0x38] sm:$0xff] %v1877_v57 }
 0x1de   :  { %1896 = dma.vmem_to_hbm [thread:$0]  %s1892_s4, 1024, %s1894_s19, [#allocation4]  }
 0x1df   :  { %2110 = dma.done.wait [#allocation4], 1024  }
 0x1e0   :  { %2111 = vsyncadd [#allocation4], 4294966272 }
 0x1e1   :  { %1901 = vsyncpa [#allocation3], 1 }
 0x1e2   :  { %1902 = vsyncpa [#allocation6], 1 }
 0x1e3   :  { %1903 = vsyncpa [#allocation9], 1 }
 0x1e4   :  { %1904 = vsyncpa [#allocation4], 1 }

</bundles_post_ra>
